<compile_context>
chip_gen: v6e
topology: v6e:2x2x1
jax: 0.10.0
libtpu: 0.0.40
codegen_flags: <defaults>
</compile_context>

<pallas_src>
import math
from functools import partial

import jax
import jax.numpy as jnp
from jax.experimental import pallas as pl
from jax.experimental.pallas import tpu as pltpu

LANE = 128     # last-dim vector tile
SUBLANE = 8    # second-to-last-dim vector tile (f32)


def _pad_to(n, m):
    return ((n + m - 1) // m) * m


def _nbytes(a):
    return a.size * a.dtype.itemsize


# ------------------------------ fused Pallas kernel --------------------------- #
def make_fused_kernel(prog, block_struct):
    """prog: static per-conv descriptors (weight-slab row offset, K, N, bias row),
    in network order: stem, then per BasicBlock conv1, conv2, [1x1 downsample].
    block_struct: per-block bool = "has a downsample branch"."""

    def kernel(x_ref, a_stem_ref, a_rest_ref, b_ref, o_ref):
        it = iter(prog)

        def conv(h):
            # One folded conv+BN as a dense GEMM: bf16 operands, f32 accumulation.
            d = next(it)
            if d["src"] == "stem":
                a = a_stem_ref[...]
            else:
                # Static, tile-aligned slice of the packed weight slab (row offsets
                # are multiples of 128) -> no dynamic indexing cost.
                a = a_rest_ref[d["row"]:d["row"] + d["k"], :d["n"]]
            b = b_ref[d["bias"]:d["bias"] + 1, :d["n"]]
            return jnp.dot(h.astype(a.dtype), a,
                           preferred_element_type=jnp.float32) + b

        # Whole batch at once: h is (n_pad, width) so every GEMM fills the
        # sublane / MXU-row dimension.
        h = jnp.maximum(conv(x_ref[...]), 0.0)           # stem conv7x7 + bn + relu
        for has_ds in block_struct:
            t = jnp.maximum(conv(h), 0.0)                # conv1 + bn1 + relu
            main = conv(t)                               # conv2 + bn2
            identity = conv(h) if has_ds else h          # optional 1x1 ds + bn
            h = jnp.maximum(main + identity, 0.0)
        o_ref[...] = h                                   # lane-dense, unmasked store

    return kernel


def fused_forward(x_nchw, a_stem, a_rest, b_all, *, prog, block_struct, out_hwc):
    """Run the whole ResNetWrapper forward as one single-step pallas_call."""
    N, C, H, W = x_nchw.shape
    d_in = H * W * C
    d_in_pad = a_stem.shape[0]
    ho, wo, co = out_hwc
    d_out = ho * wo * co
    d_out_pad = _pad_to(d_out, LANE)
    n_pad = _pad_to(max(N, SUBLANE), SUBLANE)   # fill at least one full sublane

    # NCHW -> per-sample HWC-flattened rows, zero-padded to (n_pad, d_in_pad).
    x_rows = jnp.transpose(x_nchw, (0, 2, 3, 1)).reshape(N, d_in)
    x_pad = jnp.zeros((n_pad, d_in_pad), jnp.float32).at[:N, :d_in].set(x_rows)

    flops = 2 * n_pad * sum(d["k"] * d["n"] for d in prog)
    bytes_accessed = (_nbytes(x_pad) + _nbytes(a_stem) + _nbytes(a_rest)
                      + _nbytes(b_all) + 4 * n_pad * d_out_pad)

    # No grid: one invocation, every operand is a single whole-array VMEM block
    # (default BlockSpec), so there is nothing to pipeline or double-buffer.
    out = pl.pallas_call(
        make_fused_kernel(prog, block_struct),
        out_shape=jax.ShapeDtypeStruct((n_pad, d_out_pad), jnp.float32),
        compiler_params=pltpu.CompilerParams(vmem_limit_bytes=32 * 1024 * 1024),
        cost_estimate=pl.CostEstimate(flops=flops, transcendentals=0,
                                      bytes_accessed=bytes_accessed),
    )(x_pad, a_stem, a_rest, b_all)

    out = out[:N, :d_out].reshape(N, ho, wo, co)
    return jnp.transpose(out, (0, 3, 1, 2))              # back to NCHW


# ---------------- one-time weight preprocessing (BN fold + dense unroll) ------ #
def bn_fold(gamma, beta, mean, var, eps=1e-5):
    scale = gamma / jnp.sqrt(var + eps)
    return scale, beta - mean * scale


def conv_bn_dense(w_oihw, bn, in_hwc, *, stride, pad):
    """Unroll conv2d(bias=False)+folded-BN into a dense (H*W*Cin, Ho*Wo*Cout)
    matrix acting on HWC-flattened activations, plus a (Ho*Wo*Cout,) bias."""
    H, W, Cin = in_hwc
    cout = w_oihw.shape[0]
    D = H * W * Cin
    basis = jnp.eye(D, dtype=jnp.float32).reshape(D, H, W, Cin).transpose(0, 3, 1, 2)
    y = jax.lax.conv_general_dilated(
        basis, w_oihw, (stride, stride), ((pad, pad), (pad, pad)),
        dimension_numbers=("NCHW", "OIHW", "NCHW"),
        precision=jax.lax.Precision.HIGHEST)
    _, _, Ho, Wo = y.shape
    A = jnp.transpose(y, (0, 2, 3, 1)).reshape(D, Ho * Wo * cout)
    scale, bias = bn_fold(**bn)
    A = A * jnp.tile(scale, Ho * Wo)[None, :]            # fold BN scale into weights
    b = jnp.tile(bias, Ho * Wo)                          # folded BN bias per position
    return A, b, (Ho, Wo, cout)


def build_dense_layers(params, image_hw):
    """Network-order list of folded dense layers + per-block downsample flags."""
    H, W = image_hw
    C = params["stem"]["w"].shape[1]
    layers, block_struct = [], []
    A, b, (H, W, C) = conv_bn_dense(params["stem"]["w"], params["stem"]["bn"],
                                    (H, W, C), stride=2, pad=3)
    layers.append((A, b))
    for blocks in params["layers"]:
        for blk in blocks:
            s = blk["stride"]
            A1, b1, hwc1 = conv_bn_dense(blk["conv1_w"], blk["bn1"], (H, W, C),
                                         stride=s, pad=1)
            A2, b2, hwc2 = conv_bn_dense(blk["conv2_w"], blk["bn2"], hwc1,
                                         stride=1, pad=1)
            layers += [(A1, b1), (A2, b2)]
            has_ds = "ds_w" in blk
            if has_ds:
                Ad, bd, _ = conv_bn_dense(blk["ds_w"], blk["ds_bn"], (H, W, C),
                                          stride=s, pad=0)
                layers.append((Ad, bd))
            block_struct.append(has_ds)
            H, W, C = hwc2
    return layers, tuple(block_struct), (H, W, C)


def pack_network(layers, weight_dtype=jnp.bfloat16):
    """Pad every layer's Din/Dout to multiples of 128 (zero rows/cols kept) and
    pack the per-layer operands into 3 arrays:
      a_stem : (Din0_pad, Dout0_pad) bf16        stem (wider Dout) alone
      a_rest : (sum Din_pads, 128)   bf16        all other convs, row-stacked
      b_all  : (n_convs, max Dout_pad) f32       one zero-padded bias row per conv
    plus a static per-conv descriptor list ("prog") for static ref slicing."""
    def pad2d(a, r, c):
        return jnp.zeros((r, c), a.dtype).at[:a.shape[0], :a.shape[1]].set(a)

    (A0, b0), rest = layers[0], layers[1:]
    k0, n0 = _pad_to(A0.shape[0], LANE), _pad_to(A0.shape[1], LANE)
    a_stem = pad2d(A0, k0, n0).astype(weight_dtype)

    rest_w = max(_pad_to(A.shape[1], LANE) for A, _ in rest)
    bias_w = max(n0, rest_w)

    prog = [dict(src="stem", row=0, k=k0, n=n0, bias=0)]
    biases = [jnp.pad(b0, (0, bias_w - b0.shape[0]))]
    slabs, row = [], 0
    for A, b in rest:
        k, n = _pad_to(A.shape[0], LANE), _pad_to(A.shape[1], LANE)
        slabs.append(pad2d(A, k, rest_w))
        prog.append(dict(src="rest", row=row, k=k, n=n, bias=len(biases)))
        biases.append(jnp.pad(b, (0, bias_w - b.shape[0])))
        row += k
    a_rest = jnp.concatenate(slabs, axis=0).astype(weight_dtype)
    b_all = jnp.stack(biases, axis=0).astype(jnp.float32)

    weight_bytes = a_rest.size * 2 + a_stem.size * 2 + b_all.size * 4
    # Dense unroll is O((H*W*C)^2): ~1 MiB at 16x16, but a 64x64 input would already
    # threaten v7x's 64 MiB VMEM (32 MiB scoped default).
    # TODO(synk): if this trips, switch the stem / early stages to blocked GEMMs
    # with a K-reduction grid axis and raise vmem_limit_bytes accordingly.
    assert weight_bytes < 24 * 2 ** 20, f"packed weights too large for VMEM: {weight_bytes}"
    return a_stem, a_rest, b_all, prog


# ----------------------------------- parameters -------------------------------- #
def kaiming_conv(key, cout, cin, k):
    # kaiming_normal_(mode='fan_out', nonlinearity='relu'): std = sqrt(2 / (cout*k*k))
    std = math.sqrt(2.0 / (cout * k * k))
    return std * jax.random.normal(key, (cout, cin, k, k), jnp.float32)


def bn_params(c):
    return dict(gamma=jnp.ones((c,), jnp.float32), beta=jnp.zeros((c,), jnp.float32),
                mean=jnp.zeros((c,), jnp.float32), var=jnp.ones((c,), jnp.float32))


def init_params(key, repeats, inplanes, channels, input_dim):
    params = {}
    key, k0 = jax.random.split(key)
    params["stem"] = {"w": kaiming_conv(k0, inplanes, input_dim, 7),
                      "bn": bn_params(inplanes)}
    layers = []
    in_c = inplanes
    for i, (planes, reps) in enumerate(zip(channels, repeats)):
        stage_stride = 2 if i > 0 else 1
        blocks = []
        for b in range(reps):
            s = stage_stride if b == 0 else 1
            key, k1, k2, k3 = jax.random.split(key, 4)
            blk = {
                "stride": s,
                "conv1_w": kaiming_conv(k1, planes, in_c, 3), "bn1": bn_params(planes),
                "conv2_w": kaiming_conv(k2, planes, planes, 3), "bn2": bn_params(planes),
            }
            if s != 1 or in_c != planes:  # BasicBlock.expansion == 1
                blk["ds_w"] = kaiming_conv(k3, planes, in_c, 1)
                blk["ds_bn"] = bn_params(planes)
            blocks.append(blk)
            in_c = planes
        layers.append(blocks)
    params["layers"] = layers
    return params


# ------------------------------ reference (for check) --------------------------- #
def _ref_forward(params, x):
    def conv(x, w, stride, pad):
        return jax.lax.conv_general_dilated(
            x, w, (stride, stride), ((pad, pad), (pad, pad)),
            dimension_numbers=("NCHW", "OIHW", "NCHW"))

    def bn(x, p):
        s, b = bn_fold(**p)
        return x * s[None, :, None, None] + b[None, :, None, None]

    y = jax.nn.relu(bn(conv(x, params["stem"]["w"], 2, 3), params["stem"]["bn"]))
    for blocks in params["layers"]:
        for blk in blocks:
            identity = y
            out = jax.nn.relu(bn(conv(y, blk["conv1_w"], blk["stride"], 1), blk["bn1"]))
            out = bn(conv(out, blk["conv2_w"], 1, 1), blk["bn2"])
            if "ds_w" in blk:
                identity = bn(conv(y, blk["ds_w"], blk["stride"], 0), blk["ds_bn"])
            y = jax.nn.relu(out + identity)
    return y


# ------------------------------------ main --------------------------------------- #
if __name__ == "__main__":
    repeats = [1, 2, 2, 2]
    inplanes = 8
    channels = [1, 8, 16, 32]
    input_dim = 1
    image_hw = (16, 16)

    key = jax.random.PRNGKey(0)
    pkey, xkey = jax.random.split(key)
    params = init_params(pkey, repeats, inplanes, channels, input_dim)

    # Small input consistent with the module: NCHW, 1 channel, 16x16 spatial.
    x = jax.random.normal(xkey, (2, input_dim, *image_hw), jnp.float32)

    # One-time preprocessing: BN fold + dense conv unroll + lane-aligned bf16 packing.
    layers, block_struct, out_hwc = build_dense_layers(params, image_hw)
    a_stem, a_rest, b_all, prog = pack_network(layers, weight_dtype=jnp.bfloat16)

    fwd = jax.jit(partial(fused_forward, prog=prog, block_struct=block_struct,
                          out_hwc=out_hwc))
    out = jax.block_until_ready(fwd(x, a_stem, a_rest, b_all))

    # 16 / 2 (stem) / 2 / 2 / 2 (stages 2-4) = 1 ; output_dim = channels[-1] = 32
    assert out.shape == (2, channels[-1], 1, 1), out.shape

    ref = _ref_forward(params, x)
    max_err = float(jnp.max(jnp.abs(out - ref)))
    ref_scale = float(jnp.max(jnp.abs(ref)))
    # bf16 folded weights + bf16 matmul inputs (per perf review) put the numerical
    # floor around 1e-2 relative over the 19-GEMM chain; a structural bug would show
    # up as O(1) relative error.  Check within 5% of the output scale.
    assert max_err <= 5e-2 * max(ref_scale, 1.0), (
        f"mismatch vs f32 reference: max_err={max_err}, ref_scale={ref_scale}")

    print("KERNEL_OK")
</pallas_src>

<mosaic_0001>
module attributes {stable_mosaic.version = 11 : i64} {
  func.func @kernel(%arg0: memref<8x256xf32, #tpu.memory_space<vmem>>, %arg1: memref<256x512xbf16, #tpu.memory_space<vmem>>, %arg2: memref<3072x128xbf16, #tpu.memory_space<vmem>>, %arg3: memref<19x512xf32, #tpu.memory_space<vmem>>, %arg4: memref<8x128xf32, #tpu.memory_space<vmem>>) attributes {dimension_semantics = [], scalar_prefetch = 0 : i64, scratch_operands = 0 : i64, tpu.core_type = #tpu.core_type<tc>} {
    %c0 = arith.constant 0 : index
    %c0_0 = arith.constant 0 : index
    %0 = vector.load %arg0[%c0, %c0_0] : memref<8x256xf32, #tpu.memory_space<vmem>>, vector<8x256xf32>
    %c0_1 = arith.constant 0 : index
    %c0_2 = arith.constant 0 : index
    %1 = vector.load %arg1[%c0_1, %c0_2] : memref<256x512xbf16, #tpu.memory_space<vmem>>, vector<256x512xbf16>
    %c0_3 = arith.constant 0 : index
    %c0_4 = arith.constant 0 : index
    %2 = vector.load %arg3[%c0_3, %c0_4] : memref<19x512xf32, #tpu.memory_space<vmem>>, vector<1x512xf32>
    %3 = arith.truncf %0 : vector<8x256xf32> to vector<8x256xbf16>
    %cst = arith.constant dense<0.000000e+00> : vector<8x512xf32>
    %4 = tpu.matmul %3, %1, %cst {dimension_numbers = #tpu.dot_dimension_numbers<[1], [0], [0], [1], [0, 0, 1, 1], [], []>} : vector<8x256xbf16>, vector<256x512xbf16>, vector<8x512xf32> -> vector<8x512xf32>
    %5 = vector.broadcast %2 : vector<1x512xf32> to vector<8x512xf32>
    %6 = arith.addf %4, %5 : vector<8x512xf32>
    %cst_5 = arith.constant 0.000000e+00 : f32
    %7 = vector.broadcast %cst_5 : f32 to vector<8x512xf32>
    %8 = arith.maximumf %6, %7 : vector<8x512xf32>
    %c0_6 = arith.constant 0 : index
    %c0_7 = arith.constant 0 : index
    %9 = vector.load %arg2[%c0_6, %c0_7] : memref<3072x128xbf16, #tpu.memory_space<vmem>>, vector<512x128xbf16>
    %c1 = arith.constant 1 : index
    %c0_8 = arith.constant 0 : index
    %10 = vector.load %arg3[%c1, %c0_8] : memref<19x512xf32, #tpu.memory_space<vmem>>, vector<1x128xf32>
    %11 = arith.truncf %8 : vector<8x512xf32> to vector<8x512xbf16>
    %cst_9 = arith.constant dense<0.000000e+00> : vector<8x128xf32>
    %12 = tpu.matmul %11, %9, %cst_9 {dimension_numbers = #tpu.dot_dimension_numbers<[1], [0], [0], [1], [0, 0, 1, 1], [], []>} : vector<8x512xbf16>, vector<512x128xbf16>, vector<8x128xf32> -> vector<8x128xf32>
    %13 = vector.broadcast %10 : vector<1x128xf32> to vector<8x128xf32>
    %14 = arith.addf %12, %13 : vector<8x128xf32>
    %cst_10 = arith.constant 0.000000e+00 : f32
    %15 = vector.broadcast %cst_10 : f32 to vector<8x128xf32>
    %16 = arith.maximumf %14, %15 : vector<8x128xf32>
    %c512 = arith.constant 512 : index
    %c0_11 = arith.constant 0 : index
    %17 = vector.load %arg2[%c512, %c0_11] : memref<3072x128xbf16, #tpu.memory_space<vmem>>, vector<128x128xbf16>
    %c2 = arith.constant 2 : index
    %c0_12 = arith.constant 0 : index
    %18 = vector.load %arg3[%c2, %c0_12] : memref<19x512xf32, #tpu.memory_space<vmem>>, vector<1x128xf32>
    %19 = arith.truncf %16 : vector<8x128xf32> to vector<8x128xbf16>
    %cst_13 = arith.constant dense<0.000000e+00> : vector<8x128xf32>
    %20 = tpu.matmul %19, %17, %cst_13 {dimension_numbers = #tpu.dot_dimension_numbers<[1], [0], [0], [1], [0, 0, 1, 1], [], []>} : vector<8x128xbf16>, vector<128x128xbf16>, vector<8x128xf32> -> vector<8x128xf32>
    %21 = vector.broadcast %18 : vector<1x128xf32> to vector<8x128xf32>
    %22 = arith.addf %20, %21 : vector<8x128xf32>
    %c640 = arith.constant 640 : index
    %c0_14 = arith.constant 0 : index
    %23 = vector.load %arg2[%c640, %c0_14] : memref<3072x128xbf16, #tpu.memory_space<vmem>>, vector<512x128xbf16>
    %c3 = arith.constant 3 : index
    %c0_15 = arith.constant 0 : index
    %24 = vector.load %arg3[%c3, %c0_15] : memref<19x512xf32, #tpu.memory_space<vmem>>, vector<1x128xf32>
    %25 = arith.truncf %8 : vector<8x512xf32> to vector<8x512xbf16>
    %cst_16 = arith.constant dense<0.000000e+00> : vector<8x128xf32>
    %26 = tpu.matmul %25, %23, %cst_16 {dimension_numbers = #tpu.dot_dimension_numbers<[1], [0], [0], [1], [0, 0, 1, 1], [], []>} : vector<8x512xbf16>, vector<512x128xbf16>, vector<8x128xf32> -> vector<8x128xf32>
    %27 = vector.broadcast %24 : vector<1x128xf32> to vector<8x128xf32>
    %28 = arith.addf %26, %27 : vector<8x128xf32>
    %29 = arith.addf %22, %28 : vector<8x128xf32>
    %cst_17 = arith.constant 0.000000e+00 : f32
    %30 = vector.broadcast %cst_17 : f32 to vector<8x128xf32>
    %31 = arith.maximumf %29, %30 : vector<8x128xf32>
    %c1152 = arith.constant 1152 : index
    %c0_18 = arith.constant 0 : index
    %32 = vector.load %arg2[%c1152, %c0_18] : memref<3072x128xbf16, #tpu.memory_space<vmem>>, vector<128x128xbf16>
    %c4 = arith.constant 4 : index
    %c0_19 = arith.constant 0 : index
    %33 = vector.load %arg3[%c4, %c0_19] : memref<19x512xf32, #tpu.memory_space<vmem>>, vector<1x128xf32>
    %34 = arith.truncf %31 : vector<8x128xf32> to vector<8x128xbf16>
    %cst_20 = arith.constant dense<0.000000e+00> : vector<8x128xf32>
    %35 = tpu.matmul %34, %32, %cst_20 {dimension_numbers = #tpu.dot_dimension_numbers<[1], [0], [0], [1], [0, 0, 1, 1], [], []>} : vector<8x128xbf16>, vector<128x128xbf16>, vector<8x128xf32> -> vector<8x128xf32>
    %36 = vector.broadcast %33 : vector<1x128xf32> to vector<8x128xf32>
    %37 = arith.addf %35, %36 : vector<8x128xf32>
    %cst_21 = arith.constant 0.000000e+00 : f32
    %38 = vector.broadcast %cst_21 : f32 to vector<8x128xf32>
    %39 = arith.maximumf %37, %38 : vector<8x128xf32>
    %c1280 = arith.constant 1280 : index
    %c0_22 = arith.constant 0 : index
    %40 = vector.load %arg2[%c1280, %c0_22] : memref<3072x128xbf16, #tpu.memory_space<vmem>>, vector<128x128xbf16>
    %c5 = arith.constant 5 : index
    %c0_23 = arith.constant 0 : index
    %41 = vector.load %arg3[%c5, %c0_23] : memref<19x512xf32, #tpu.memory_space<vmem>>, vector<1x128xf32>
    %42 = arith.truncf %39 : vector<8x128xf32> to vector<8x128xbf16>
    %cst_24 = arith.constant dense<0.000000e+00> : vector<8x128xf32>
    %43 = tpu.matmul %42, %40, %cst_24 {dimension_numbers = #tpu.dot_dimension_numbers<[1], [0], [0], [1], [0, 0, 1, 1], [], []>} : vector<8x128xbf16>, vector<128x128xbf16>, vector<8x128xf32> -> vector<8x128xf32>
    %44 = vector.broadcast %41 : vector<1x128xf32> to vector<8x128xf32>
    %45 = arith.addf %43, %44 : vector<8x128xf32>
    %c1408 = arith.constant 1408 : index
    %c0_25 = arith.constant 0 : index
    %46 = vector.load %arg2[%c1408, %c0_25] : memref<3072x128xbf16, #tpu.memory_space<vmem>>, vector<128x128xbf16>
    %c6 = arith.constant 6 : index
    %c0_26 = arith.constant 0 : index
    %47 = vector.load %arg3[%c6, %c0_26] : memref<19x512xf32, #tpu.memory_space<vmem>>, vector<1x128xf32>
    %48 = arith.truncf %31 : vector<8x128xf32> to vector<8x128xbf16>
    %cst_27 = arith.constant dense<0.000000e+00> : vector<8x128xf32>
    %49 = tpu.matmul %48, %46, %cst_27 {dimension_numbers = #tpu.dot_dimension_numbers<[1], [0], [0], [1], [0, 0, 1, 1], [], []>} : vector<8x128xbf16>, vector<128x128xbf16>, vector<8x128xf32> -> vector<8x128xf32>
    %50 = vector.broadcast %47 : vector<1x128xf32> to vector<8x128xf32>
    %51 = arith.addf %49, %50 : vector<8x128xf32>
    %52 = arith.addf %45, %51 : vector<8x128xf32>
    %cst_28 = arith.constant 0.000000e+00 : f32
    %53 = vector.broadcast %cst_28 : f32 to vector<8x128xf32>
    %54 = arith.maximumf %52, %53 : vector<8x128xf32>
    %c1536 = arith.constant 1536 : index
    %c0_29 = arith.constant 0 : index
    %55 = vector.load %arg2[%c1536, %c0_29] : memref<3072x128xbf16, #tpu.memory_space<vmem>>, vector<128x128xbf16>
    %c7 = arith.constant 7 : index
    %c0_30 = arith.constant 0 : index
    %56 = vector.load %arg3[%c7, %c0_30] : memref<19x512xf32, #tpu.memory_space<vmem>>, vector<1x128xf32>
    %57 = arith.truncf %54 : vector<8x128xf32> to vector<8x128xbf16>
    %cst_31 = arith.constant dense<0.000000e+00> : vector<8x128xf32>
    %58 = tpu.matmul %57, %55, %cst_31 {dimension_numbers = #tpu.dot_dimension_numbers<[1], [0], [0], [1], [0, 0, 1, 1], [], []>} : vector<8x128xbf16>, vector<128x128xbf16>, vector<8x128xf32> -> vector<8x128xf32>
    %59 = vector.broadcast %56 : vector<1x128xf32> to vector<8x128xf32>
    %60 = arith.addf %58, %59 : vector<8x128xf32>
    %cst_32 = arith.constant 0.000000e+00 : f32
    %61 = vector.broadcast %cst_32 : f32 to vector<8x128xf32>
    %62 = arith.maximumf %60, %61 : vector<8x128xf32>
    %c1664 = arith.constant 1664 : index
    %c0_33 = arith.constant 0 : index
    %63 = vector.load %arg2[%c1664, %c0_33] : memref<3072x128xbf16, #tpu.memory_space<vmem>>, vector<128x128xbf16>
    %c8 = arith.constant 8 : index
    %c0_34 = arith.constant 0 : index
    %64 = vector.load %arg3[%c8, %c0_34] : memref<19x512xf32, #tpu.memory_space<vmem>>, vector<1x128xf32>
    %65 = arith.truncf %62 : vector<8x128xf32> to vector<8x128xbf16>
    %cst_35 = arith.constant dense<0.000000e+00> : vector<8x128xf32>
    %66 = tpu.matmul %65, %63, %cst_35 {dimension_numbers = #tpu.dot_dimension_numbers<[1], [0], [0], [1], [0, 0, 1, 1], [], []>} : vector<8x128xbf16>, vector<128x128xbf16>, vector<8x128xf32> -> vector<8x128xf32>
    %67 = vector.broadcast %64 : vector<1x128xf32> to vector<8x128xf32>
    %68 = arith.addf %66, %67 : vector<8x128xf32>
    %69 = arith.addf %68, %54 : vector<8x128xf32>
    %cst_36 = arith.constant 0.000000e+00 : f32
    %70 = vector.broadcast %cst_36 : f32 to vector<8x128xf32>
    %71 = arith.maximumf %69, %70 : vector<8x128xf32>
    %c1792 = arith.constant 1792 : index
    %c0_37 = arith.constant 0 : index
    %72 = vector.load %arg2[%c1792, %c0_37] : memref<3072x128xbf16, #tpu.memory_space<vmem>>, vector<128x128xbf16>
    %c9 = arith.constant 9 : index
    %c0_38 = arith.constant 0 : index
    %73 = vector.load %arg3[%c9, %c0_38] : memref<19x512xf32, #tpu.memory_space<vmem>>, vector<1x128xf32>
    %74 = arith.truncf %71 : vector<8x128xf32> to vector<8x128xbf16>
    %cst_39 = arith.constant dense<0.000000e+00> : vector<8x128xf32>
    %75 = tpu.matmul %74, %72, %cst_39 {dimension_numbers = #tpu.dot_dimension_numbers<[1], [0], [0], [1], [0, 0, 1, 1], [], []>} : vector<8x128xbf16>, vector<128x128xbf16>, vector<8x128xf32> -> vector<8x128xf32>
    %76 = vector.broadcast %73 : vector<1x128xf32> to vector<8x128xf32>
    %77 = arith.addf %75, %76 : vector<8x128xf32>
    %cst_40 = arith.constant 0.000000e+00 : f32
    %78 = vector.broadcast %cst_40 : f32 to vector<8x128xf32>
    %79 = arith.maximumf %77, %78 : vector<8x128xf32>
    %c1920 = arith.constant 1920 : index
    %c0_41 = arith.constant 0 : index
    %80 = vector.load %arg2[%c1920, %c0_41] : memref<3072x128xbf16, #tpu.memory_space<vmem>>, vector<128x128xbf16>
    %c10 = arith.constant 10 : index
    %c0_42 = arith.constant 0 : index
    %81 = vector.load %arg3[%c10, %c0_42] : memref<19x512xf32, #tpu.memory_space<vmem>>, vector<1x128xf32>
    %82 = arith.truncf %79 : vector<8x128xf32> to vector<8x128xbf16>
    %cst_43 = arith.constant dense<0.000000e+00> : vector<8x128xf32>
    %83 = tpu.matmul %82, %80, %cst_43 {dimension_numbers = #tpu.dot_dimension_numbers<[1], [0], [0], [1], [0, 0, 1, 1], [], []>} : vector<8x128xbf16>, vector<128x128xbf16>, vector<8x128xf32> -> vector<8x128xf32>
    %84 = vector.broadcast %81 : vector<1x128xf32> to vector<8x128xf32>
    %85 = arith.addf %83, %84 : vector<8x128xf32>
    %c2048 = arith.constant 2048 : index
    %c0_44 = arith.constant 0 : index
    %86 = vector.load %arg2[%c2048, %c0_44] : memref<3072x128xbf16, #tpu.memory_space<vmem>>, vector<128x128xbf16>
    %c11 = arith.constant 11 : index
    %c0_45 = arith.constant 0 : index
    %87 = vector.load %arg3[%c11, %c0_45] : memref<19x512xf32, #tpu.memory_space<vmem>>, vector<1x128xf32>
    %88 = arith.truncf %71 : vector<8x128xf32> to vector<8x128xbf16>
    %cst_46 = arith.constant dense<0.000000e+00> : vector<8x128xf32>
    %89 = tpu.matmul %88, %86, %cst_46 {dimension_numbers = #tpu.dot_dimension_numbers<[1], [0], [0], [1], [0, 0, 1, 1], [], []>} : vector<8x128xbf16>, vector<128x128xbf16>, vector<8x128xf32> -> vector<8x128xf32>
    %90 = vector.broadcast %87 : vector<1x128xf32> to vector<8x128xf32>
    %91 = arith.addf %89, %90 : vector<8x128xf32>
    %92 = arith.addf %85, %91 : vector<8x128xf32>
    %cst_47 = arith.constant 0.000000e+00 : f32
    %93 = vector.broadcast %cst_47 : f32 to vector<8x128xf32>
    %94 = arith.maximumf %92, %93 : vector<8x128xf32>
    %c2176 = arith.constant 2176 : index
    %c0_48 = arith.constant 0 : index
    %95 = vector.load %arg2[%c2176, %c0_48] : memref<3072x128xbf16, #tpu.memory_space<vmem>>, vector<128x128xbf16>
    %c12 = arith.constant 12 : index
    %c0_49 = arith.constant 0 : index
    %96 = vector.load %arg3[%c12, %c0_49] : memref<19x512xf32, #tpu.memory_space<vmem>>, vector<1x128xf32>
    %97 = arith.truncf %94 : vector<8x128xf32> to vector<8x128xbf16>
    %cst_50 = arith.constant dense<0.000000e+00> : vector<8x128xf32>
    %98 = tpu.matmul %97, %95, %cst_50 {dimension_numbers = #tpu.dot_dimension_numbers<[1], [0], [0], [1], [0, 0, 1, 1], [], []>} : vector<8x128xbf16>, vector<128x128xbf16>, vector<8x128xf32> -> vector<8x128xf32>
    %99 = vector.broadcast %96 : vector<1x128xf32> to vector<8x128xf32>
    %100 = arith.addf %98, %99 : vector<8x128xf32>
    %cst_51 = arith.constant 0.000000e+00 : f32
    %101 = vector.broadcast %cst_51 : f32 to vector<8x128xf32>
    %102 = arith.maximumf %100, %101 : vector<8x128xf32>
    %c2304 = arith.constant 2304 : index
    %c0_52 = arith.constant 0 : index
    %103 = vector.load %arg2[%c2304, %c0_52] : memref<3072x128xbf16, #tpu.memory_space<vmem>>, vector<128x128xbf16>
    %c13 = arith.constant 13 : index
    %c0_53 = arith.constant 0 : index
    %104 = vector.load %arg3[%c13, %c0_53] : memref<19x512xf32, #tpu.memory_space<vmem>>, vector<1x128xf32>
    %105 = arith.truncf %102 : vector<8x128xf32> to vector<8x128xbf16>
    %cst_54 = arith.constant dense<0.000000e+00> : vector<8x128xf32>
    %106 = tpu.matmul %105, %103, %cst_54 {dimension_numbers = #tpu.dot_dimension_numbers<[1], [0], [0], [1], [0, 0, 1, 1], [], []>} : vector<8x128xbf16>, vector<128x128xbf16>, vector<8x128xf32> -> vector<8x128xf32>
    %107 = vector.broadcast %104 : vector<1x128xf32> to vector<8x128xf32>
    %108 = arith.addf %106, %107 : vector<8x128xf32>
    %109 = arith.addf %108, %94 : vector<8x128xf32>
    %cst_55 = arith.constant 0.000000e+00 : f32
    %110 = vector.broadcast %cst_55 : f32 to vector<8x128xf32>
    %111 = arith.maximumf %109, %110 : vector<8x128xf32>
    %c2432 = arith.constant 2432 : index
    %c0_56 = arith.constant 0 : index
    %112 = vector.load %arg2[%c2432, %c0_56] : memref<3072x128xbf16, #tpu.memory_space<vmem>>, vector<128x128xbf16>
    %c14 = arith.constant 14 : index
    %c0_57 = arith.constant 0 : index
    %113 = vector.load %arg3[%c14, %c0_57] : memref<19x512xf32, #tpu.memory_space<vmem>>, vector<1x128xf32>
    %114 = arith.truncf %111 : vector<8x128xf32> to vector<8x128xbf16>
    %cst_58 = arith.constant dense<0.000000e+00> : vector<8x128xf32>
    %115 = tpu.matmul %114, %112, %cst_58 {dimension_numbers = #tpu.dot_dimension_numbers<[1], [0], [0], [1], [0, 0, 1, 1], [], []>} : vector<8x128xbf16>, vector<128x128xbf16>, vector<8x128xf32> -> vector<8x128xf32>
    %116 = vector.broadcast %113 : vector<1x128xf32> to vector<8x128xf32>
    %117 = arith.addf %115, %116 : vector<8x128xf32>
    %cst_59 = arith.constant 0.000000e+00 : f32
    %118 = vector.broadcast %cst_59 : f32 to vector<8x128xf32>
    %119 = arith.maximumf %117, %118 : vector<8x128xf32>
    %c2560 = arith.constant 2560 : index
    %c0_60 = arith.constant 0 : index
    %120 = vector.load %arg2[%c2560, %c0_60] : memref<3072x128xbf16, #tpu.memory_space<vmem>>, vector<128x128xbf16>
    %c15 = arith.constant 15 : index
    %c0_61 = arith.constant 0 : index
    %121 = vector.load %arg3[%c15, %c0_61] : memref<19x512xf32, #tpu.memory_space<vmem>>, vector<1x128xf32>
    %122 = arith.truncf %119 : vector<8x128xf32> to vector<8x128xbf16>
    %cst_62 = arith.constant dense<0.000000e+00> : vector<8x128xf32>
    %123 = tpu.matmul %122, %120, %cst_62 {dimension_numbers = #tpu.dot_dimension_numbers<[1], [0], [0], [1], [0, 0, 1, 1], [], []>} : vector<8x128xbf16>, vector<128x128xbf16>, vector<8x128xf32> -> vector<8x128xf32>
    %124 = vector.broadcast %121 : vector<1x128xf32> to vector<8x128xf32>
    %125 = arith.addf %123, %124 : vector<8x128xf32>
    %c2688 = arith.constant 2688 : index
    %c0_63 = arith.constant 0 : index
    %126 = vector.load %arg2[%c2688, %c0_63] : memref<3072x128xbf16, #tpu.memory_space<vmem>>, vector<128x128xbf16>
    %c16 = arith.constant 16 : index
    %c0_64 = arith.constant 0 : index
    %127 = vector.load %arg3[%c16, %c0_64] : memref<19x512xf32, #tpu.memory_space<vmem>>, vector<1x128xf32>
    %128 = arith.truncf %111 : vector<8x128xf32> to vector<8x128xbf16>
    %cst_65 = arith.constant dense<0.000000e+00> : vector<8x128xf32>
    %129 = tpu.matmul %128, %126, %cst_65 {dimension_numbers = #tpu.dot_dimension_numbers<[1], [0], [0], [1], [0, 0, 1, 1], [], []>} : vector<8x128xbf16>, vector<128x128xbf16>, vector<8x128xf32> -> vector<8x128xf32>
    %130 = vector.broadcast %127 : vector<1x128xf32> to vector<8x128xf32>
    %131 = arith.addf %129, %130 : vector<8x128xf32>
    %132 = arith.addf %125, %131 : vector<8x128xf32>
    %cst_66 = arith.constant 0.000000e+00 : f32
    %133 = vector.broadcast %cst_66 : f32 to vector<8x128xf32>
    %134 = arith.maximumf %132, %133 : vector<8x128xf32>
    %c2816 = arith.constant 2816 : index
    %c0_67 = arith.constant 0 : index
    %135 = vector.load %arg2[%c2816, %c0_67] : memref<3072x128xbf16, #tpu.memory_space<vmem>>, vector<128x128xbf16>
    %c17 = arith.constant 17 : index
    %c0_68 = arith.constant 0 : index
    %136 = vector.load %arg3[%c17, %c0_68] : memref<19x512xf32, #tpu.memory_space<vmem>>, vector<1x128xf32>
    %137 = arith.truncf %134 : vector<8x128xf32> to vector<8x128xbf16>
    %cst_69 = arith.constant dense<0.000000e+00> : vector<8x128xf32>
    %138 = tpu.matmul %137, %135, %cst_69 {dimension_numbers = #tpu.dot_dimension_numbers<[1], [0], [0], [1], [0, 0, 1, 1], [], []>} : vector<8x128xbf16>, vector<128x128xbf16>, vector<8x128xf32> -> vector<8x128xf32>
    %139 = vector.broadcast %136 : vector<1x128xf32> to vector<8x128xf32>
    %140 = arith.addf %138, %139 : vector<8x128xf32>
    %cst_70 = arith.constant 0.000000e+00 : f32
    %141 = vector.broadcast %cst_70 : f32 to vector<8x128xf32>
    %142 = arith.maximumf %140, %141 : vector<8x128xf32>
    %c2944 = arith.constant 2944 : index
    %c0_71 = arith.constant 0 : index
    %143 = vector.load %arg2[%c2944, %c0_71] : memref<3072x128xbf16, #tpu.memory_space<vmem>>, vector<128x128xbf16>
    %c18 = arith.constant 18 : index
    %c0_72 = arith.constant 0 : index
    %144 = vector.load %arg3[%c18, %c0_72] : memref<19x512xf32, #tpu.memory_space<vmem>>, vector<1x128xf32>
    %145 = arith.truncf %142 : vector<8x128xf32> to vector<8x128xbf16>
    %cst_73 = arith.constant dense<0.000000e+00> : vector<8x128xf32>
    %146 = tpu.matmul %145, %143, %cst_73 {dimension_numbers = #tpu.dot_dimension_numbers<[1], [0], [0], [1], [0, 0, 1, 1], [], []>} : vector<8x128xbf16>, vector<128x128xbf16>, vector<8x128xf32> -> vector<8x128xf32>
    %147 = vector.broadcast %144 : vector<1x128xf32> to vector<8x128xf32>
    %148 = arith.addf %146, %147 : vector<8x128xf32>
    %149 = arith.addf %148, %134 : vector<8x128xf32>
    %cst_74 = arith.constant 0.000000e+00 : f32
    %150 = vector.broadcast %cst_74 : f32 to vector<8x128xf32>
    %151 = arith.maximumf %149, %150 : vector<8x128xf32>
    %c0_75 = arith.constant 0 : index
    %c0_76 = arith.constant 0 : index
    %152 = vector.load %arg4[%c0_75, %c0_76] : memref<8x128xf32, #tpu.memory_space<vmem>>, vector<8x128xf32>
    tpu.vector_store %arg4[%c0_75, %c0_76], %151 {strides = array<i32>} : memref<8x128xf32, #tpu.memory_space<vmem>>, vector<8x128xf32>,
    return
  }
}

</mosaic_0001>

<bundles_post_ra>
// kernel: fused_forward.1
= control target key start
LH: loop header
LB: loop body
LE: loop exit
PB: predicated region body
PF: predicated region fallthrough
CT: control target
= control target key end

     0   :  { %9 = vsyncpa [#allocation3], 0  ;;  %s4357_s0 = inlined_call_operand.vmem [shape: f32[8,256], index: 0, kind: input, shape index: {}]   ;;  %s4358_s1 = inlined_call_operand.hbm [shape: bf16[256,512], index: 1, kind: input, shape index: {}]   ;;  %s4359_s2 = inlined_call_operand.hbm [shape: bf16[3072,128], index: 2, kind: input, shape index: {}]   ;;  %s4360_s3 = inlined_call_operand.hbm [shape: f32[19,512], index: 3, kind: input, shape index: {}]   ;;  %s4361_s4 = inlined_call_operand.vmem [shape: f32[8,128], index: 4, kind: output, shape index: {}]  }
   0x1   :  { %10 = vsyncpa [#allocation5], 0  ;;  %s4125_s15 = smov [#allocation4]  }
   0x2   :  { %s30_s16 = sshll.u32 %s4125_s15, 4  ;;  %s31_s16 = int_to_ptr.vmem [resolvable:$true] %s30_s16 }
   0x3   :  { %s4069_s17 = scalar_lea.vmem %s31_s16, 24576  ;;  %p4074_p1 = scmp.lt.s32.totalorder %s31_s16, %s31_s16 }
   0x4   :  { %p4070_p0 = scmp.ne.s32.totalorder %s31_s16, %s4069_s17  ;;  %p4075_p2 = scmp.lt.s32.totalorder %s4069_s17, %s4069_s17 }
   0x6   :  { %p4076_p3 = por %p4075_p2, %p4074_p1 }
   0x8   :  { %p4077_p4 = pnand %p4076_p3, %p4070_p0 }
   0xa   :  { %4080 = shalt.err (!%p4077_p4)
}
   0xb   :  { %s4126_s18 = smov 64   ;;  %s4127_s19 = smov 4  }
   0xc   :  { %36 = dma.hbm_to_vmem [thread:$0]  %s4359_s2, 24576, %s31_s16, [#allocation5], %s4126_s18, %s4126_s18, %s4127_s19  }
   0xd   :  { %s4128_s22 = smov [#allocation2]  }
   0xe   :  { %s18_s23 = sshll.u32 %s4128_s22, 4  ;;  %s19_s23 = int_to_ptr.vmem [resolvable:$true] %s18_s23 }
   0xf   :  { %s4089_s24 = scalar_lea.vmem %s19_s23, 8192  ;;  %p4094_p6 = scmp.lt.s32.totalorder %s19_s23, %s19_s23 }
  0x10   :  { %p4090_p5 = scmp.ne.s32.totalorder %s19_s23, %s4089_s24  ;;  %p4095_p7 = scmp.lt.s32.totalorder %s4089_s24, %s4089_s24 }
  0x12   :  { %p4096_p8 = por %p4095_p7, %p4094_p6 }
  0x14   :  { %p4097_p9 = pnand %p4096_p8, %p4090_p5 }
  0x16   :  { %4100 = shalt.err (!%p4097_p9)
}
  0x17   :  { %s4129_s25 = smov 256   ;;  %s4130_s26 = smov 16  }
  0x18   :  { %24 = dma.hbm_to_vmem [thread:$0]  %s4358_s1, 8192, %s19_s23, [#allocation3], %s4129_s25, %s4129_s25, %s4130_s26  }
  0x19   :  { %s4131_s29 = smov [#allocation6]  }
  0x1a   :  { %s42_s30 = sshll.u32 %s4131_s29, 4  ;;  %s43_s30 = int_to_ptr.vmem [resolvable:$true] %s42_s30 }
  0x1b   :  { %s4109_s2 = scalar_lea.vmem %s43_s30, 1536  ;;  %p4114_p11 = scmp.lt.s32.totalorder %s43_s30, %s43_s30 }
  0x1c   :  { %p4110_p10 = scmp.ne.s32.totalorder %s43_s30, %s4109_s2  ;;  %p4115_p12 = scmp.lt.s32.totalorder %s4109_s2, %s4109_s2 }
  0x1e   :  { %p4116_p13 = por %p4115_p12, %p4114_p11 }
  0x20   :  { %p4117_p0 = pnand %p4116_p13, %p4110_p10 }
  0x22   :  { %4120 = shalt.err (!%p4117_p0)
}
  0x23   :  { %s4132_s5 = smov 512   ;;  %s4133_s6 = smov 32  }
  0x24   :  { %48 = dma.hbm_to_vmem [thread:$0]  %s4360_s3, 1536, %s43_s30, [#allocation5], %s4132_s5, %s4132_s5, %s4133_s6  }
  0x25   :  { %4121 = dma.done.wait [#allocation3], 8192  }
  0x26   :  { %4122 = vsyncadd [#allocation3], 4294959104 }
  0x27   :  { %4123 = dma.done.wait [#allocation5], 26112  }
  0x28   :  { %4124 = vsyncadd [#allocation5], 4294941184  ;;  %v3773_v0 = vld [vmem:[#allocation2 + $0xe4] ss:$16 sps:$4 sm:$0xff]   ;;  %v3775_v1 = vld [vmem:[#allocation2 + $0xec] ss:$16 sps:$4 sm:$0xff]  }
  0x29   :  { %469 = vmatprep.subr.bf16.mxu0 %v3773_v0  ;;  %v3777_v2 = vld [vmem:[#allocation2 + $0xe0] ss:$16 sps:$4 sm:$0xff]   ;;  %v3778_v3 = vld [vmem:[#allocation2 + $0xe8] ss:$16 sps:$4 sm:$0xff]   ;;  %510 = vmatprep.subr.bf16.mxu1 %v3775_v1  ;;  %v3779_v4 = vld [vmem:[#allocation2 + $0xc4] ss:$16 sps:$4 sm:$0xff]  }
  0x2a   :  { %470 = vmatpush1.bf16.msra.mxu0 %v3777_v2  ;;  %511 = vmatpush1.bf16.msra.mxu1 %v3778_v3  ;;  %v3781_v5 = vld [vmem:[#allocation2 + $0xcc] ss:$16 sps:$4 sm:$0xff]   ;;  %v3783_v6 = vld [vmem:[#allocation2 + $0xc0] ss:$16 sps:$4 sm:$0xff]   ;;  %v3784_v7 = vld [vmem:[#allocation2 + $0xc8] ss:$16 sps:$4 sm:$0xff]  }
  0x2b   :  { %471 = vmatprep.subr.bf16.mxu0 %v3779_v4  ;;  %512 = vmatprep.subr.bf16.mxu1 %v3781_v5  ;;  %v3785_v8 = vld [vmem:[#allocation2 + $0xa4] ss:$16 sps:$4 sm:$0xff]   ;;  %v3787_v9 = vld [vmem:[#allocation2 + $0xac] ss:$16 sps:$4 sm:$0xff]   ;;  %v3789_v10 = vld [vmem:[#allocation2 + $0xa0] ss:$16 sps:$4 sm:$0xff]  }
  0x2c   :  { %v3790_v11 = vld [vmem:[#allocation2 + $0xa8] ss:$16 sps:$4 sm:$0xff]   ;;  %v3791_v12 = vld [vmem:[#allocation2 + $0x84] ss:$16 sps:$4 sm:$0xff]   ;;  %v3793_v13 = vld [vmem:[#allocation2 + $0x8c] ss:$16 sps:$4 sm:$0xff]  }
  0x2d   :  { %v3795_v14 = vld [vmem:[#allocation2 + $0x80] ss:$16 sps:$4 sm:$0xff]   ;;  %v3796_v15 = vld [vmem:[#allocation2 + $0x88] ss:$16 sps:$4 sm:$0xff]   ;;  %v3797_v16 = vld [vmem:[#allocation2 + $0x64] ss:$16 sps:$4 sm:$0xff]  }
  0x2e   :  { %472 = vmatpush1.bf16.msra.mxu0 %v3783_v6  ;;  %513 = vmatpush1.bf16.msra.mxu1 %v3784_v7  ;;  %v3799_v17 = vld [vmem:[#allocation2 + $0x6c] ss:$16 sps:$4 sm:$0xff]   ;;  %v3801_v18 = vld [vmem:[#allocation2 + $0x60] ss:$16 sps:$4 sm:$0xff]   ;;  %v3802_v19 = vld [vmem:[#allocation2 + $0x68] ss:$16 sps:$4 sm:$0xff]  }
  0x2f   :  { %473 = vmatprep.subr.bf16.mxu0 %v3785_v8  ;;  %514 = vmatprep.subr.bf16.mxu1 %v3787_v9  ;;  %v3803_v20 = vld [vmem:[#allocation2 + $0x44] ss:$16 sps:$4 sm:$0xff]   ;;  %v3805_v21 = vld [vmem:[#allocation2 + $0x4c] ss:$16 sps:$4 sm:$0xff]   ;;  %v3807_v22 = vld [vmem:[#allocation2 + $0x40] ss:$16 sps:$4 sm:$0xff]  }
  0x30   :  { %v3808_v23 = vld [vmem:[#allocation2 + $0x48] ss:$16 sps:$4 sm:$0xff]   ;;  %v3809_v24 = vld [vmem:[#allocation2 + $0x24] ss:$16 sps:$4 sm:$0xff]   ;;  %v3811_v25 = vld [vmem:[#allocation2 + $0x2c] ss:$16 sps:$4 sm:$0xff]  }
  0x31   :  { %v3813_v26 = vld [vmem:[#allocation2 + $0x20] ss:$16 sps:$4 sm:$0xff]   ;;  %v3814_v27 = vld [vmem:[#allocation2 + $0x28] ss:$16 sps:$4 sm:$0xff]   ;;  %v3815_v28 = vld [vmem:[#allocation2 + $0x4] ss:$16 sps:$4 sm:$0xff]  }
  0x32   :  { %474 = vmatpush1.bf16.msra.mxu0 %v3789_v10  ;;  %515 = vmatpush1.bf16.msra.mxu1 %v3790_v11  ;;  %v3817_v29 = vld [vmem:[#allocation2 + $0xc] ss:$16 sps:$4 sm:$0xff]   ;;  %v3819_v30 = vld [vmem:[#allocation2] ss:$16 sps:$4 sm:$0xff]   ;;  %v3820_v31 = vld [vmem:[#allocation2 + $0x8] ss:$16 sps:$4 sm:$0xff]  }
  0x33   :  { %475 = vmatprep.subr.bf16.mxu0 %v3791_v12  ;;  %516 = vmatprep.subr.bf16.mxu1 %v3793_v13  ;;  %v3821_v32 = vld [vmem:[#allocation2 + $0x1e4] ss:$16 sps:$4 sm:$0xff]   ;;  %v3823_v33 = vld [vmem:[#allocation2 + $0x1ec] ss:$16 sps:$4 sm:$0xff]   ;;  %v3825_v34 = vld [vmem:[#allocation2 + $0x1e0] ss:$16 sps:$4 sm:$0xff]  }
  0x34   :  { %v3826_v35 = vld [vmem:[#allocation2 + $0x1e8] ss:$16 sps:$4 sm:$0xff]   ;;  %v3827_v36 = vld [vmem:[#allocation2 + $0x1c4] ss:$16 sps:$4 sm:$0xff]   ;;  %v3829_v37 = vld [vmem:[#allocation2 + $0x1cc] ss:$16 sps:$4 sm:$0xff]  }
  0x35   :  { %v3831_v38 = vld [vmem:[#allocation2 + $0x1c0] ss:$16 sps:$4 sm:$0xff]   ;;  %v3832_v39 = vld [vmem:[#allocation2 + $0x1c8] ss:$16 sps:$4 sm:$0xff]   ;;  %v3833_v40 = vld [vmem:[#allocation2 + $0x1a4] ss:$16 sps:$4 sm:$0xff]  }
  0x36   :  { %476 = vmatpush1.bf16.msra.mxu0 %v3795_v14  ;;  %517 = vmatpush1.bf16.msra.mxu1 %v3796_v15  ;;  %v3835_v41 = vld [vmem:[#allocation2 + $0x1ac] ss:$16 sps:$4 sm:$0xff]   ;;  %v3837_v42 = vld [vmem:[#allocation2 + $0x1a0] ss:$16 sps:$4 sm:$0xff]   ;;  %v3838_v43 = vld [vmem:[#allocation2 + $0x1a8] ss:$16 sps:$4 sm:$0xff]  }
  0x37   :  { %477 = vmatprep.subr.bf16.mxu0 %v3797_v16  ;;  %518 = vmatprep.subr.bf16.mxu1 %v3799_v17  ;;  %v3839_v44 = vld [vmem:[#allocation2 + $0x184] ss:$16 sps:$4 sm:$0xff]   ;;  %v3841_v45 = vld [vmem:[#allocation2 + $0x18c] ss:$16 sps:$4 sm:$0xff]   ;;  %v3843_v46 = vld [vmem:[#allocation2 + $0x180] ss:$16 sps:$4 sm:$0xff]  }
  0x38   :  { %v60_v47 = vld [vmem:[%s4357_s0 + $0x8] sm:$0xff]  ;;  %v3845_v50 = vld [vmem:[#allocation2 + $0x164] ss:$16 sps:$4 sm:$0xff]   ;;  %v3849_v52 = vld [vmem:[#allocation2 + $0x160] ss:$16 sps:$4 sm:$0xff]   ;;  %vm4135_vm0 = vmmov 0  }
  0x39   :  { %v3844_v48 = vld [vmem:[#allocation2 + $0x188] ss:$16 sps:$4 sm:$0xff]   ;;  %v127_v49 = vpack.c.bf16 %v60_v47, %v60_v47  ;;  %v3847_v51 = vld [vmem:[#allocation2 + $0x16c] ss:$16 sps:$4 sm:$0xff]   ;;  %v3851_v54 = vld [vmem:[#allocation2 + $0x144] ss:$16 sps:$4 sm:$0xff]  }
  0x3a   :  { %478 = vmatpush1.bf16.msra.mxu0 %v3801_v18  ;;  %519 = vmatpush1.bf16.msra.mxu1 %v3802_v19  ;;  %v3850_v53 = vld [vmem:[#allocation2 + $0x168] ss:$16 sps:$4 sm:$0xff]   ;;  %v3853_v55 = vld [vmem:[#allocation2 + $0x14c] ss:$16 sps:$4 sm:$0xff]   ;;  %v3855_v56 = vld [vmem:[#allocation2 + $0x140] ss:$16 sps:$4 sm:$0xff]  }
  0x3b   :  { %479 = vmatprep.subr.bf16.mxu0 %v3803_v20  ;;  %520 = vmatprep.subr.bf16.mxu1 %v3805_v21  ;;  %v3856_v57 = vld [vmem:[#allocation2 + $0x148] ss:$16 sps:$4 sm:$0xff]   ;;  %v3857_v58 = vld [vmem:[#allocation2 + $0x124] ss:$16 sps:$4 sm:$0xff]   ;;  %v3859_v59 = vld [vmem:[#allocation2 + $0x12c] ss:$16 sps:$4 sm:$0xff]  }
  0x3c   :  { %501 = vmatprep.mubr.bf16.mxu0 %v127_v49  ;;  %542 = vmatprep.mubr.bf16.mxu1 %v127_v49  ;;  %v3861_v60 = vld [vmem:[#allocation2 + $0x120] ss:$16 sps:$4 sm:$0xff]   ;;  %v3862_v61 = vld [vmem:[#allocation2 + $0x128] ss:$16 sps:$4 sm:$0xff]   ;;  %v3863_v62 = vld [vmem:[#allocation2 + $0x104] ss:$16 sps:$4 sm:$0xff]  }
  0x3d   :  { %v3865_v63 = vld [vmem:[#allocation2 + $0x10c] ss:$16 sps:$4 sm:$0xff]   ;;  %v3867_v0 = vld [vmem:[#allocation2 + $0x100] ss:$16 sps:$4 sm:$0xff]   ;;  %v3868_v1 = vld [vmem:[#allocation2 + $0x108] ss:$16 sps:$4 sm:$0xff]  }
  0x3e   :  { %480 = vmatpush1.bf16.msra.mxu0 %v3807_v22  ;;  %521 = vmatpush1.bf16.msra.mxu1 %v3808_v23  ;;  %v59_v2 = vld [vmem:[%s4357_s0] sm:$0xff]  ;;  %v3869_v3 = vld [vmem:[#allocation4 + $0xf8] sm:$0xff]   ;;  %v3873_v8 = vld [vmem:[#allocation4 + $0xf0] sm:$0xff]  }
  0x3f   :  { %481 = vmatprep.subr.bf16.mxu0 %v3809_v24  ;;  %522 = vmatprep.subr.bf16.mxu1 %v3811_v25  ;;  %v3870_v4 = vld [vmem:[#allocation4 + $0x78] sm:$0xff]   ;;  %v126_v6 = vpack.c.bf16 %v59_v2, %v59_v2  ;;  %v3874_v9 = vld [vmem:[#allocation4 + $0x70] sm:$0xff]   ;;  %v3877_v12 = vld [vmem:[#allocation4 + $0xe8] sm:$0xff]  }
  0x40   :  { %v3871_v5 = vld [vmem:[#allocation4 + $0xb8] sm:$0xff]   ;;  %v3875_v10 = vld [vmem:[#allocation4 + $0xb0] sm:$0xff]   ;;  %v3878_v13 = vld [vmem:[#allocation4 + $0x68] sm:$0xff]  }
  0x41   :  { %v3872_v7 = vld [vmem:[#allocation4 + $0x38] sm:$0xff]   ;;  %v3876_v11 = vld [vmem:[#allocation4 + $0x30] sm:$0xff]   ;;  %v3879_v14 = vld [vmem:[#allocation4 + $0xa8] sm:$0xff]  }
  0x42   :  { %482 = vmatpush1.bf16.msra.mxu0 %v3813_v26  ;;  %523 = vmatpush1.bf16.msra.mxu1 %v3814_v27  ;;  %v3880_v15 = vld [vmem:[#allocation4 + $0x28] sm:$0xff]   ;;  %v3881_v16 = vld [vmem:[#allocation4 + $0xe0] sm:$0xff]   ;;  %v3885_v20 = vld [vmem:[#allocation4 + $0xd8] sm:$0xff]  }
  0x43   :  { %483 = vmatprep.subr.bf16.mxu0 %v3815_v28  ;;  %524 = vmatprep.subr.bf16.mxu1 %v3817_v29  ;;  %v3882_v17 = vld [vmem:[#allocation4 + $0x60] sm:$0xff]   ;;  %v3886_v21 = vld [vmem:[#allocation4 + $0x58] sm:$0xff]   ;;  %v3889_v24 = vld [vmem:[#allocation4 + $0xd0] sm:$0xff]  }
  0x44   :  { %v3883_v18 = vld [vmem:[#allocation4 + $0xa0] sm:$0xff]   ;;  %v3887_v22 = vld [vmem:[#allocation4 + $0x98] sm:$0xff]   ;;  %v3890_v25 = vld [vmem:[#allocation4 + $0x50] sm:$0xff]  }
  0x45   :  { %v3884_v19 = vld [vmem:[#allocation4 + $0x20] sm:$0xff]   ;;  %v3888_v23 = vld [vmem:[#allocation4 + $0x18] sm:$0xff]   ;;  %v3891_v26 = vld [vmem:[#allocation4 + $0x90] sm:$0xff]  }
  0x46   :  { %484 = vmatpush1.bf16.msra.mxu0 %v3819_v30  ;;  %525 = vmatpush1.bf16.msra.mxu1 %v3820_v31  ;;  %v3892_v27 = vld [vmem:[#allocation4 + $0x10] sm:$0xff]   ;;  %v3893_v28 = vld [vmem:[#allocation4 + $0xc8] sm:$0xff]  }
  0x47   :  { %485 = vmatprep.subr.bf16.mxu0 %v3821_v32  ;;  %526 = vmatprep.subr.bf16.mxu1 %v3823_v33  ;;  %v3894_v29 = vld [vmem:[#allocation4 + $0x48] sm:$0xff]   ;;  %v3897_v32 = vld [vmem:[#allocation4 + $0xc0] sm:$0xff]  }
  0x48   :  { %v3895_v30 = vld [vmem:[#allocation4 + $0x88] sm:$0xff]   ;;  %v3898_v33 = vld [vmem:[#allocation4 + $0x40] sm:$0xff]  }
  0x49   :  { %v3896_v31 = vld [vmem:[#allocation4 + $0x8] sm:$0xff]  }
  0x4a   :  { %486 = vmatpush2.bf16.msra.mxu0 %v3825_v34  ;;  %527 = vmatpush2.bf16.msra.mxu1 %v3826_v35  ;;  %v3899_v34 = vld [vmem:[#allocation4 + $0x80] sm:$0xff]  }
  0x4b   :  { %487 = vmatprep.subr.bf16.mxu0 %v3827_v36  ;;  %528 = vmatprep.subr.bf16.mxu1 %v3829_v37  ;;  %v3900_v35 = vld [vmem:[#allocation4] sm:$0xff]   ;;  %v3901_v36 = vld [vmem:[#allocation4 + $0x1b8] sm:$0xff]   ;;  %v4134_v37 = vmov 0.0  }
  0x4e   :  { %488 = vmatpush2.bf16.msra.mxu0 %v3831_v38  ;;  %529 = vmatpush2.bf16.msra.mxu1 %v3832_v39  ;;  %v129_v38 = vlaneseq }
  0x4f   :  { %489 = vmatprep.subr.bf16.mxu0 %v3833_v40  ;;  %530 = vmatprep.subr.bf16.mxu1 %v3835_v41 }
  0x50   :  { %v130_v39 = vshrl.u32 %v129_v38, 7 }
  0x52   :  { %490 = vmatpush2.bf16.msra.mxu0 %v3837_v42  ;;  %531 = vmatpush2.bf16.msra.mxu1 %v3838_v43  ;;  %v131_v40 = vsub.s32 0, %v130_v39  ;;  %v139_v41 = vsub.s32 2, %v130_v39  ;;  %v125_v42 = vld [vmem:[#allocation6] ss:$8 sm:$0xf]  ;;  %v135_v43 = vsub.s32 1, %v130_v39 }
  0x53   :  { %491 = vmatprep.subr.bf16.mxu0 %v3839_v44  ;;  %532 = vmatprep.subr.bf16.mxu1 %v3841_v45  ;;  %v143_v44 = vsub.s32 3, %v130_v39 }
  0x54   :  { %v132_v45 = vrot.slane %v125_v42, %v131_v40  ;;  %v136_v47 = vrot.slane %v125_v42, %v135_v43 }
  0x56   :  { %492 = vmatpush2.bf16.msra.mxu0 %v3843_v46  ;;  %533 = vmatpush2.bf16.msra.mxu1 %v3844_v48  ;;  %v140_v46 = vrot.slane %v125_v42, %v139_v41  ;;  %v144_v48 = vrot.slane %v125_v42, %v143_v44  ;;  %v3926_v44 = vld [vmem:[#allocation4 + $0x1f8] sm:$0xff]  }
  0x57   :  { %493 = vmatprep.subr.bf16.mxu0 %v3845_v50  ;;  %534 = vmatprep.subr.bf16.mxu1 %v3847_v51 }
  0x5a   :  { %494 = vmatpush2.bf16.msra.mxu0 %v3849_v52  ;;  %535 = vmatpush2.bf16.msra.mxu1 %v3850_v53 }
  0x5b   :  { %495 = vmatprep.subr.bf16.mxu0 %v3851_v54  ;;  %536 = vmatprep.subr.bf16.mxu1 %v3853_v55 }
  0x5e   :  { %496 = vmatpush2.bf16.msra.mxu0 %v3855_v56  ;;  %537 = vmatpush2.bf16.msra.mxu1 %v3856_v57 }
  0x5f   :  { %497 = vmatprep.subr.bf16.mxu0 %v3857_v58  ;;  %538 = vmatprep.subr.bf16.mxu1 %v3859_v59 }
  0x62   :  { %498 = vmatpush2.bf16.msra.mxu0 %v3861_v60  ;;  %539 = vmatpush2.bf16.msra.mxu1 %v3862_v61 }
  0x63   :  { %499 = vmatprep.subr.bf16.mxu0 %v3863_v62  ;;  %540 = vmatprep.subr.bf16.mxu1 %v3865_v63 }
  0x66   :  { %500 = vmatpush2.bf16.msra.mxu0 %v3867_v0  ;;  %541 = vmatpush2.bf16.msra.mxu1 %v3868_v1 }
  0x67   :  { %3232 = vmatprep.subr.bf16.mxu1 %v3869_v3  ;;  %3210 = vmatprep.subr.bf16.mxu0 %v3870_v4  ;;  %v3902_v4 = vld [vmem:[#allocation4 + $0x178] sm:$0xff]  }
  0x69   :  { %502 = vmatmul.mubr.bf16.vlgmr.msra.gmra.mxu0 %v126_v6  ;;  %543 = vmatmul.mubr.bf16.vlgmr.msra.gmra.mxu1 %v126_v6  ;;  %v3903_v6 = vld [vmem:[#allocation4 + $0x1b0] sm:$0xff]  }
  0x6a   :  { %3233 = vmatpush3.bf16.msra.mxu1 %v3871_v5  ;;  %3211 = vmatpush3.bf16.msra.mxu0 %v3872_v7  ;;  %v3917_v7 = vld [vmem:[#allocation4 + $0x138] sm:$0xff]  }
  0x6b   :  { %3234 = vmatprep.subr.bf16.mxu1 %v3873_v8  ;;  %3212 = vmatprep.subr.bf16.mxu0 %v3874_v9  ;;  %v3904_v8 = vld [vmem:[#allocation4 + $0x170] sm:$0xff]   ;;  %v3905_v9 = vld [vmem:[#allocation4 + $0x1a8] sm:$0xff]  }
  0x6e   :  { %3235 = vmatpush3.bf16.msra.mxu1 %v3875_v10  ;;  %3213 = vmatpush3.bf16.msra.mxu0 %v3876_v11  ;;  %v3918_v10 = vld [vmem:[#allocation4 + $0x130] sm:$0xff]   ;;  %v3906_v11 = vld [vmem:[#allocation4 + $0x168] sm:$0xff]  }
  0x6f   :  { %3236 = vmatprep.subr.bf16.mxu1 %v3877_v12  ;;  %3214 = vmatprep.subr.bf16.mxu0 %v3878_v13  ;;  %v3907_v12 = vld [vmem:[#allocation4 + $0x1a0] sm:$0xff]   ;;  %v3919_v13 = vld [vmem:[#allocation4 + $0x128] sm:$0xff]  }
  0x72   :  { %3237 = vmatpush3.bf16.msra.mxu1 %v3879_v14  ;;  %3215 = vmatpush3.bf16.msra.mxu0 %v3880_v15  ;;  %v3908_v14 = vld [vmem:[#allocation4 + $0x160] sm:$0xff]   ;;  %v3909_v15 = vld [vmem:[#allocation4 + $0x198] sm:$0xff]  }
  0x73   :  { %3238 = vmatprep.subr.bf16.mxu1 %v3881_v16  ;;  %3216 = vmatprep.subr.bf16.mxu0 %v3882_v17  ;;  %v3920_v16 = vld [vmem:[#allocation4 + $0x120] sm:$0xff]   ;;  %v3910_v17 = vld [vmem:[#allocation4 + $0x158] sm:$0xff]  }
  0x76   :  { %3239 = vmatpush3.bf16.msra.mxu1 %v3883_v18  ;;  %3217 = vmatpush3.bf16.msra.mxu0 %v3884_v19  ;;  %v3911_v18 = vld [vmem:[#allocation4 + $0x190] sm:$0xff]   ;;  %v3921_v19 = vld [vmem:[#allocation4 + $0x118] sm:$0xff]  }
  0x77   :  { %3240 = vmatprep.subr.bf16.mxu1 %v3885_v20  ;;  %3218 = vmatprep.subr.bf16.mxu0 %v3886_v21  ;;  %v3912_v20 = vld [vmem:[#allocation4 + $0x150] sm:$0xff]   ;;  %v3913_v21 = vld [vmem:[#allocation4 + $0x188] sm:$0xff]  }
  0x7a   :  { %3241 = vmatpush3.bf16.msra.mxu1 %v3887_v22  ;;  %3219 = vmatpush3.bf16.msra.mxu0 %v3888_v23  ;;  %v3914_v22 = vld [vmem:[#allocation4 + $0x148] sm:$0xff]   ;;  %v3915_v23 = vld [vmem:[#allocation4 + $0x180] sm:$0xff]  }
  0x7b   :  { %3242 = vmatprep.subr.bf16.mxu1 %v3889_v24  ;;  %3220 = vmatprep.subr.bf16.mxu0 %v3890_v25  ;;  %v3916_v24 = vld [vmem:[#allocation4 + $0x140] sm:$0xff]   ;;  %v3922_v25 = vld [vmem:[#allocation4 + $0x110] sm:$0xff]  }
  0x7e   :  { %3243 = vmatpush3.bf16.msra.mxu1 %v3891_v26  ;;  %3221 = vmatpush3.bf16.msra.mxu0 %v3892_v27  ;;  %v3923_v26 = vld [vmem:[#allocation4 + $0x108] sm:$0xff]   ;;  %v3924_v27 = vld [vmem:[#allocation4 + $0x100] sm:$0xff]  }
  0x7f   :  { %3244 = vmatprep.subr.bf16.mxu1 %v3893_v28  ;;  %3222 = vmatprep.subr.bf16.mxu0 %v3894_v29  ;;  %v3925_v28 = vld [vmem:[#allocation4 + $0x238] sm:$0xff]  }
  0x82   :  { %3245 = vmatpush3.bf16.msra.mxu1 %v3895_v30  ;;  %3223 = vmatpush3.bf16.msra.mxu0 %v3896_v31  ;;  %v619_v31 = vld [vmem:[#allocation6 + $0x1] ss:$0 sm:$0xff] }
  0x83   :  { %3246 = vmatprep.subr.bf16.mxu1 %v3897_v32  ;;  %3224 = vmatprep.subr.bf16.mxu0 %v3898_v33 }
  0x86   :  { %3247 = vmatpush3.bf16.msra.mxu1 %v3899_v34  ;;  %3225 = vmatpush3.bf16.msra.mxu0 %v3900_v35 }
  0x87   :  { %3263 = vmatprep.subr.bf16.mxu1 %v3901_v36  ;;  %3442 = vmatprep.subr.bf16.mxu0 %v4134_v37 }
 0x129   :  { %v503_v49 = vpop.f32.mrf.mxu0  ;;  %v544_v50 = vpop.f32.mrf.mxu1 }
 0x12a   :  { %v504_v51 = vadd.f32 %v503_v49, %v132_v45  ;;  %v545_v52 = vadd.f32 %v544_v50, %v140_v46  ;;  %v3927_v46 = vld [vmem:[#allocation4 + $0x230] sm:$0xff]   ;;  %v3930_v49 = vld [vmem:[#allocation4 + $0x1e8] sm:$0xff]   ;;  %v3931_v50 = vld [vmem:[#allocation4 + $0x220] sm:$0xff]  }
 0x12b   :  { %v505_v53 = vpop.f32.mrf.mxu0  ;;  %v546_v54 = vpop.f32.mrf.mxu1 }
 0x12c   :  { %v553_v55 = vmax.f32 %v545_v52, 0.0  ;;  %v506_v56 = vadd.f32 %v505_v53, %v136_v47  ;;  %v547_v57 = vadd.f32 %v546_v54, %v144_v48  ;;  %v551_v58 = vmax.f32 %v504_v51, 0.0  ;;  %v3928_v47 = vld [vmem:[#allocation4 + $0x1f0] sm:$0xff]   ;;  %v3929_v48 = vld [vmem:[#allocation4 + $0x228] sm:$0xff]   ;;  %v3932_v51 = vld [vmem:[#allocation4 + $0x1e0] sm:$0xff]  }
 0x12d   :  { %v507_v59 = vpop.f32.mrf.mxu0  ;;  %v548_v60 = vpop.f32.mrf.mxu1  ;;  %v3933_v52 = vld [vmem:[#allocation4 + $0x218] sm:$0xff]   ;;  %v3935_v54 = vld [vmem:[#allocation4 + $0x210] sm:$0xff]  }
 0x12e   :  { %v552_v61 = vmax.f32 %v506_v56, 0.0  ;;  %v554_v62 = vmax.f32 %v547_v57, 0.0  ;;  %v4177_v63 = vpack.c.bf16 %v553_v55, %v553_v55  ;;  %v620_v5 = vpack.c.bf16 %v551_v58, %v551_v58  ;;  %v3934_v53 = vld [vmem:[#allocation4 + $0x1d8] sm:$0xff]   ;;  %v3936_v55 = vld [vmem:[#allocation4 + $0x1d0] sm:$0xff]   ;;  %v3937_v56 = vld [vmem:[#allocation4 + $0x208] sm:$0xff]  }
 0x12f   :  { %v508_v0 = vpop.f32.mrf.mxu0  ;;  %v549_v1 = vpop.f32.mrf.mxu1  ;;  %v3938_v59 = vld [vmem:[#allocation4 + $0x1c8] sm:$0xff]  }
 0x130   :  { %v621_v2 = vpack.c.bf16 %v552_v61, %v552_v61  ;;  %v4179_v3 = vpack.c.bf16 %v554_v62, %v554_v62  ;;  %v3939_v61 = vld [vmem:[#allocation4 + $0x200] sm:$0xff]  }
 0x131   :  { %v3940_v1 = vld [vmem:[#allocation4 + $0x1c0] sm:$0xff]  }
 0x132   :  { %848 = vmatprep.mubr.bf16.mxu0 %v621_v2  ;;  %888 = vmatprep.mubr.bf16.mxu1 %v4179_v3 }
 0x133   :  { %849 = vmatmul.mubr.bf16.vlgmr.msra.gmra.mxu0 %v620_v5  ;;  %889 = vmatmul.mubr.bf16.vlgmr.msra.gmra.mxu1 %v4177_v63 }
 0x134   :  { %3264 = vmatpush3.bf16.msra.mxu1 %v3902_v4  ;;  %1292 = vmatprep.mubr.bf16.mxu1 %v621_v2  ;;  %v3941_v2 = vld [vmem:[#allocation4 + $0x278] sm:$0xff]   ;;  %v3943_v4 = vld [vmem:[#allocation4 + $0x268] sm:$0xff]  }
 0x135   :  { %3265 = vmatprep.subr.bf16.mxu1 %v3903_v6  ;;  %3443 = vmatpush3.bf16.msra.mxu0 %v3917_v7  ;;  %v3945_v6 = vld [vmem:[#allocation4 + $0x258] sm:$0xff]   ;;  %v3947_v7 = vld [vmem:[#allocation4 + $0x248] sm:$0xff]  }
 0x136   :  { %3444 = vmatprep.subr.bf16.mxu0 %v4134_v37  ;;  %3458 = vmatprep.mubr.msk.bf16.mxu0 %vm4135_vm0, %v4134_v37 }
 0x138   :  { %3266 = vmatpush3.bf16.msra.mxu1 %v3904_v8  ;;  %v3948_v8 = vld [vmem:[#allocation4 + $0x240] sm:$0xff]  }
 0x139   :  { %3267 = vmatprep.subr.bf16.mxu1 %v3905_v9  ;;  %3445 = vmatpush3.bf16.msra.mxu0 %v3918_v10  ;;  %v3957_v9 = vld [vmem:[#allocation4 + $0x2b8] sm:$0xff]   ;;  %v3958_v10 = vld [vmem:[#allocation4 + $0x2b0] sm:$0xff]  }
 0x13a   :  { %3446 = vmatprep.subr.bf16.mxu0 %v4134_v37 }
 0x13c   :  { %3268 = vmatpush3.bf16.msra.mxu1 %v3906_v11  ;;  %v3959_v11 = vld [vmem:[#allocation4 + $0x2a8] sm:$0xff]  }
 0x13d   :  { %3269 = vmatprep.subr.bf16.mxu1 %v3907_v12  ;;  %3447 = vmatpush3.bf16.msra.mxu0 %v3919_v13  ;;  %v3960_v12 = vld [vmem:[#allocation4 + $0x2a0] sm:$0xff]   ;;  %v3961_v13 = vld [vmem:[#allocation4 + $0x298] sm:$0xff]  }
 0x13e   :  { %3448 = vmatprep.subr.bf16.mxu0 %v4134_v37 }
 0x140   :  { %3270 = vmatpush3.bf16.msra.mxu1 %v3908_v14  ;;  %v3962_v14 = vld [vmem:[#allocation4 + $0x290] sm:$0xff]  }
 0x141   :  { %3271 = vmatprep.subr.bf16.mxu1 %v3909_v15  ;;  %3449 = vmatpush3.bf16.msra.mxu0 %v3920_v16 }
 0x142   :  { %3450 = vmatprep.subr.bf16.mxu0 %v4134_v37 }
 0x144   :  { %3272 = vmatpush3.bf16.msra.mxu1 %v3910_v17 }
 0x145   :  { %3273 = vmatprep.subr.bf16.mxu1 %v3911_v18  ;;  %3451 = vmatpush3.bf16.msra.mxu0 %v3921_v19  ;;  %v1067_v19 = vld [vmem:[#allocation6 + $0x3] ss:$0 sm:$0xff] }
 0x146   :  { %3452 = vmatprep.subr.bf16.mxu0 %v4134_v37 }
 0x148   :  { %3274 = vmatpush3.bf16.msra.mxu1 %v3912_v20 }
 0x149   :  { %3275 = vmatprep.subr.bf16.mxu1 %v3913_v21  ;;  %3453 = vmatpush3.bf16.msra.mxu0 %v3922_v25  ;;  %v913_v21 = vld [vmem:[#allocation6 + $0x2] ss:$0 sm:$0xff] }
 0x14a   :  { %3454 = vmatprep.subr.bf16.mxu0 %v4134_v37 }
 0x14c   :  { %3276 = vmatpush3.bf16.msra.mxu1 %v3914_v22 }
 0x14d   :  { %3277 = vmatprep.subr.bf16.mxu1 %v3915_v23  ;;  %3455 = vmatpush3.bf16.msra.mxu0 %v3923_v26 }
 0x14e   :  { %3456 = vmatprep.subr.bf16.mxu0 %v4134_v37 }
 0x150   :  { %3278 = vmatpush3.bf16.msra.mxu1 %v3916_v24 }
 0x151   :  { %3462 = vmatprep.subr.bf16.mxu1 %v4134_v37  ;;  %3457 = vmatpush3.bf16.msra.mxu0 %v3924_v27 }
 0x152   :  { %3285 = vmatprep.subr.bf16.mxu0 %v3925_v28 }
 0x153   :  { %1293 = vmatmul.mubr.bf16.vlgmr.msra.gmra.mxu1 %v620_v5  ;;  %v3944_v5 = vld [vmem:[#allocation4 + $0x260] sm:$0xff]  }
 0x154   :  { %3478 = vmatprep.mubr.msk.bf16.mxu1 %vm4135_vm0, %v4134_v37  ;;  %3463 = vmatpush3.bf16.msra.mxu1 %v3941_v2  ;;  %v3975_v2 = vld [vmem:[#allocation4 + $0x368] sm:$0xff]  }
 0x155   :  { %3464 = vmatprep.subr.bf16.mxu1 %v4134_v37 }
 0x1f3   :  { %v3226_v29 = vpop.f32.mrf.mxu0  ;;  %v3248_v30 = vpop.f32.mrf.mxu1 }
 0x1f5   :  { %v3227_v32 = vpop.f32.mrf.mxu0  ;;  %v3249_v33 = vpop.f32.mrf.mxu1 }
 0x1f6   :  { %v3228_v34 = vadd.f32 %v3227_v32, %v3226_v29  ;;  %v3250_v39 = vadd.f32 %v3249_v33, %v3248_v30  ;;  %v3950_v33 = vld [vmem:[#allocation4 + $0x2f0] sm:$0xff]  }
 0x1f7   :  { %v3229_v35 = vpop.f32.mrf.mxu0  ;;  %v3251_v36 = vpop.f32.mrf.mxu1 }
 0x1f8   :  { %v851_v38 = vadd.f32 %v3228_v34, %v619_v31  ;;  %v3949_v31 = vld [vmem:[#allocation4 + $0x2f8] sm:$0xff]   ;;  %v3951_v34 = vld [vmem:[#allocation4 + $0x2e8] sm:$0xff]   ;;  %v3952_v35 = vld [vmem:[#allocation4 + $0x2e0] sm:$0xff]  }
 0x1f9   :  { %v3230_v40 = vpop.f32.mrf.mxu0  ;;  %v3252_v41 = vpop.f32.mrf.mxu1  ;;  %v3953_v36 = vld [vmem:[#allocation4 + $0x2d8] sm:$0xff]  }
 0x1fa   :  { %v891_v42 = vadd.f32 %v3250_v39, %v851_v38  ;;  %v3954_v38 = vld [vmem:[#allocation4 + $0x2d0] sm:$0xff]   ;;  %v3955_v39 = vld [vmem:[#allocation4 + $0x2c8] sm:$0xff]   ;;  %v3956_v40 = vld [vmem:[#allocation4 + $0x2c0] sm:$0xff]  }
 0x1fb   :  { %v3963_v41 = vld [vmem:[#allocation4 + $0x288] sm:$0xff]  }
 0x1fc   :  { %v896_v43 = vmax.f32 %v891_v42, 0.0  ;;  %v3964_v42 = vld [vmem:[#allocation4 + $0x280] sm:$0xff]  }
 0x1fe   :  { %v914_v45 = vpack.c.bf16 %v896_v43, %v896_v43  ;;  %v1358_v43 = vld [vmem:[#allocation6 + $0x4] ss:$0 sm:$0xff] }
 0x200   :  { %3459 = vmatmul.mubr.bf16.vlgmr.msra.gmra.mxu0 %v914_v45 }
 0x201   :  { %3286 = vmatpush3.bf16.msra.mxu0 %v3926_v44  ;;  %1332 = vmatprep.mubr.bf16.mxu0 %v4179_v3  ;;  %v3942_v3 = vld [vmem:[#allocation4 + $0x270] sm:$0xff]  }
 0x202   :  { %3287 = vmatprep.subr.bf16.mxu0 %v3927_v46  ;;  %3465 = vmatpush3.bf16.msra.mxu1 %v3942_v3  ;;  %v3976_v3 = vld [vmem:[#allocation4 + $0x360] sm:$0xff]  }
 0x203   :  { %3466 = vmatprep.subr.bf16.mxu1 %v4134_v37 }
 0x205   :  { %3288 = vmatpush3.bf16.msra.mxu0 %v3928_v47 }
 0x206   :  { %3289 = vmatprep.subr.bf16.mxu0 %v3929_v48  ;;  %3467 = vmatpush3.bf16.msra.mxu1 %v3943_v4  ;;  %v3977_v4 = vld [vmem:[#allocation4 + $0x358] sm:$0xff]  }
 0x207   :  { %3468 = vmatprep.subr.bf16.mxu1 %v4134_v37 }
 0x209   :  { %3290 = vmatpush3.bf16.msra.mxu0 %v3930_v49  ;;  %v3965_v49 = vld [vmem:[#allocation4 + $0x338] sm:$0xff]  }
 0x20a   :  { %3291 = vmatprep.subr.bf16.mxu0 %v3931_v50  ;;  %3469 = vmatpush3.bf16.msra.mxu1 %v3944_v5  ;;  %v3978_v5 = vld [vmem:[#allocation4 + $0x350] sm:$0xff]  }
 0x20b   :  { %3470 = vmatprep.subr.bf16.mxu1 %v4134_v37 }
 0x20d   :  { %3292 = vmatpush3.bf16.msra.mxu0 %v3932_v51 }
 0x20e   :  { %3293 = vmatprep.subr.bf16.mxu0 %v3933_v52  ;;  %3471 = vmatpush3.bf16.msra.mxu1 %v3945_v6  ;;  %v3966_v52 = vld [vmem:[#allocation4 + $0x330] sm:$0xff]   ;;  %v1571_v6 = vld [vmem:[#allocation6 + $0x6] ss:$0 sm:$0xff] }
 0x20f   :  { %3472 = vmatprep.subr.bf16.mxu1 %v4134_v37 }
 0x211   :  { %3294 = vmatpush3.bf16.msra.mxu0 %v3934_v53  ;;  %v3967_v53 = vld [vmem:[#allocation4 + $0x328] sm:$0xff]  }
 0x212   :  { %3295 = vmatprep.subr.bf16.mxu0 %v3935_v54  ;;  %v3968_v54 = vld [vmem:[#allocation4 + $0x320] sm:$0xff]  }
 0x213   :  { %v3279_v57 = vpop.f32.mrf.mxu1 }
 0x215   :  { %v3280_v58 = vpop.f32.mrf.mxu1  ;;  %3296 = vmatpush3.bf16.msra.mxu0 %v3936_v55  ;;  %v3969_v55 = vld [vmem:[#allocation4 + $0x318] sm:$0xff]  }
 0x216   :  { %v3281_v60 = vadd.f32 %v3280_v58, %v3279_v57  ;;  %3297 = vmatprep.subr.bf16.mxu0 %v3937_v56  ;;  %v3970_v56 = vld [vmem:[#allocation4 + $0x310] sm:$0xff]  }
 0x217   :  { %v3282_v62 = vpop.f32.mrf.mxu1 }
 0x218   :  { %v1295_v23 = vadd.f32 %v3281_v60, %v1067_v19  ;;  %v3972_v62 = vld [vmem:[#allocation4 + $0x300] sm:$0xff]   ;;  %v3982_v19 = vld [vmem:[#allocation4 + $0x3b0] sm:$0xff]  }
 0x219   :  { %v3283_v0 = vpop.f32.mrf.mxu1  ;;  %3298 = vmatpush3.bf16.msra.mxu0 %v3938_v59 }
 0x21a   :  { %3299 = vmatprep.subr.bf16.mxu0 %v3939_v61  ;;  %v3971_v61 = vld [vmem:[#allocation4 + $0x308] sm:$0xff]   ;;  %v3973_v0 = vld [vmem:[#allocation4 + $0x378] sm:$0xff]  }
 0x21d   :  { %3300 = vmatpush3.bf16.msra.mxu0 %v3940_v1  ;;  %v3974_v1 = vld [vmem:[#allocation4 + $0x370] sm:$0xff]  }
 0x21e   :  { %3482 = vmatprep.subr.bf16.mxu0 %v4134_v37 }
 0x220   :  { %1333 = vmatmul.mubr.bf16.vlgmr.msra.gmra.mxu0 %v4177_v63  ;;  %v3946_v63 = vld [vmem:[#allocation4 + $0x250] sm:$0xff]  }
 0x221   :  { %3498 = vmatprep.mubr.msk.bf16.mxu0 %vm4135_vm0, %v4134_v37  ;;  %3473 = vmatpush3.bf16.msra.mxu1 %v3946_v63  ;;  %v1465_v63 = vld [vmem:[#allocation6 + $0x5] ss:$0 sm:$0xff] }
 0x222   :  { %3474 = vmatprep.subr.bf16.mxu1 %v4134_v37  ;;  %3483 = vmatpush3.bf16.msra.mxu0 %v3957_v9 }
 0x223   :  { %3484 = vmatprep.subr.bf16.mxu0 %v4134_v37 }
 0x225   :  { %3475 = vmatpush3.bf16.msra.mxu1 %v3947_v7 }
 0x226   :  { %3476 = vmatprep.subr.bf16.mxu1 %v4134_v37  ;;  %3485 = vmatpush3.bf16.msra.mxu0 %v3958_v10 }
 0x227   :  { %3486 = vmatprep.subr.bf16.mxu0 %v4134_v37 }
 0x229   :  { %3477 = vmatpush3.bf16.msra.mxu1 %v3948_v8 }
 0x22a   :  { %3502 = vmatprep.subr.bf16.mxu1 %v4134_v37  ;;  %3487 = vmatpush3.bf16.msra.mxu0 %v3959_v11 }
 0x22b   :  { %3488 = vmatprep.subr.bf16.mxu0 %v4134_v37 }
 0x22e   :  { %3489 = vmatpush3.bf16.msra.mxu0 %v3960_v12 }
 0x22f   :  { %3490 = vmatprep.subr.bf16.mxu0 %v4134_v37 }
 0x232   :  { %3491 = vmatpush3.bf16.msra.mxu0 %v3961_v13 }
 0x233   :  { %3492 = vmatprep.subr.bf16.mxu0 %v4134_v37 }
 0x236   :  { %3493 = vmatpush3.bf16.msra.mxu0 %v3962_v14 }
 0x237   :  { %3494 = vmatprep.subr.bf16.mxu0 %v4134_v37 }
 0x23a   :  { %3495 = vmatpush3.bf16.msra.mxu0 %v3963_v41  ;;  %v1785_v41 = vld [vmem:[#allocation6 + $0x20] ss:$0 sm:$0xff] }
 0x23b   :  { %3496 = vmatprep.subr.bf16.mxu0 %v4134_v37 }
 0x23e   :  { %3497 = vmatpush3.bf16.msra.mxu0 %v3964_v42 }
 0x23f   :  { %3522 = vmatprep.subr.bf16.mxu0 %v4134_v37 }
 0x2c0   :  { %v997_v15 = vpop.f32.mrf.mxu0 }
 0x2c1   :  { %v998_v26 = vadd.f32 %v997_v15, %v913_v21  ;;  %v3984_v21 = vld [vmem:[#allocation4 + $0x3a0] sm:$0xff]  }
 0x2c2   :  { %v3460_v16 = vpop.f32.mrf.mxu0 }
 0x2c3   :  { %v3979_v16 = vld [vmem:[#allocation4 + $0x348] sm:$0xff]  }
 0x2c4   :  { %v1000_v17 = vpop.f32.mrf.mxu0 }
 0x2c5   :  { %v3980_v17 = vld [vmem:[#allocation4 + $0x340] sm:$0xff]  }
 0x2c6   :  { %v3461_v18 = vpop.f32.mrf.mxu0 }
 0x2c7   :  { %v3981_v18 = vld [vmem:[#allocation4 + $0x3b8] sm:$0xff]  }
 0x2e0   :  { %v3301_v20 = vpop.f32.mrf.mxu0 }
 0x2e2   :  { %v3302_v22 = vpop.f32.mrf.mxu0 }
 0x2e3   :  { %v3303_v24 = vadd.f32 %v3302_v22, %v3301_v20  ;;  %v3983_v20 = vld [vmem:[#allocation4 + $0x3a8] sm:$0xff]   ;;  %v3985_v22 = vld [vmem:[#allocation4 + $0x398] sm:$0xff]  }
 0x2e4   :  { %v3304_v25 = vpop.f32.mrf.mxu0 }
 0x2e5   :  { %v1335_v27 = vadd.f32 %v3303_v24, %v1295_v23  ;;  %v3986_v23 = vld [vmem:[#allocation4 + $0x390] sm:$0xff]   ;;  %v1678_v24 = vld [vmem:[#allocation6 + $0x7] ss:$0 sm:$0xff] }
 0x2e6   :  { %v3305_v28 = vpop.f32.mrf.mxu0 }
 0x2e7   :  { %v1340_v29 = vadd.f32 %v1335_v27, %v998_v26 }
 0x2e9   :  { %v1341_v30 = vmax.f32 %v1340_v29, 0.0 }
 0x2eb   :  { %v1359_v32 = vpack.c.bf16 %v1341_v30, %v1341_v30 }
 0x2ed   :  { %3479 = vmatmul.mubr.bf16.vlgmr.msra.gmra.mxu1 %v1359_v32 }
 0x2ee   :  { %3503 = vmatpush3.bf16.msra.mxu1 %v3949_v31  ;;  %3518 = vmatprep.mubr.msk.bf16.mxu1 %vm4135_vm0, %v4134_v37 }
 0x2ef   :  { %3504 = vmatprep.subr.bf16.mxu1 %v4134_v37 }
 0x2f2   :  { %3505 = vmatpush3.bf16.msra.mxu1 %v3950_v33  ;;  %v3988_v33 = vld [vmem:[#allocation4 + $0x380] sm:$0xff]  }
 0x2f3   :  { %3506 = vmatprep.subr.bf16.mxu1 %v4134_v37 }
 0x2f6   :  { %3507 = vmatpush3.bf16.msra.mxu1 %v3951_v34  ;;  %v3997_v34 = vld [vmem:[#allocation4 + $0x3f8] sm:$0xff]  }
 0x2f7   :  { %3508 = vmatprep.subr.bf16.mxu1 %v4134_v37 }
 0x2fa   :  { %3509 = vmatpush3.bf16.msra.mxu1 %v3952_v35  ;;  %v3998_v35 = vld [vmem:[#allocation4 + $0x3f0] sm:$0xff]  }
 0x2fb   :  { %3510 = vmatprep.subr.bf16.mxu1 %v4134_v37 }
 0x2fe   :  { %3511 = vmatpush3.bf16.msra.mxu1 %v3953_v36  ;;  %v3999_v36 = vld [vmem:[#allocation4 + $0x3e8] sm:$0xff]  }
 0x2ff   :  { %3512 = vmatprep.subr.bf16.mxu1 %v4134_v37 }
 0x302   :  { %3513 = vmatpush3.bf16.msra.mxu1 %v3954_v38  ;;  %v4000_v38 = vld [vmem:[#allocation4 + $0x3e0] sm:$0xff]  }
 0x303   :  { %3514 = vmatprep.subr.bf16.mxu1 %v4134_v37 }
 0x306   :  { %3515 = vmatpush3.bf16.msra.mxu1 %v3955_v39  ;;  %v4001_v39 = vld [vmem:[#allocation4 + $0x3d8] sm:$0xff]  }
 0x307   :  { %3516 = vmatprep.subr.bf16.mxu1 %v4134_v37 }
 0x30a   :  { %3517 = vmatpush3.bf16.msra.mxu1 %v3956_v40  ;;  %v4002_v40 = vld [vmem:[#allocation4 + $0x3d0] sm:$0xff]  }
 0x30b   :  { %3542 = vmatprep.subr.bf16.mxu1 %v4134_v37 }
 0x30d   :  { %3519 = vmatmul.mubr.bf16.vlgmr.msra.gmra.mxu1 %v1359_v32  ;;  %v3987_v32 = vld [vmem:[#allocation4 + $0x388] sm:$0xff]  }
 0x30e   :  { %3558 = vmatprep.mubr.msk.bf16.mxu1 %vm4135_vm0, %v4134_v37  ;;  %3543 = vmatpush3.bf16.msra.mxu1 %v3973_v0 }
 0x30f   :  { %3544 = vmatprep.subr.bf16.mxu1 %v4134_v37 }
 0x312   :  { %3545 = vmatpush3.bf16.msra.mxu1 %v3974_v1 }
 0x313   :  { %3546 = vmatprep.subr.bf16.mxu1 %v4134_v37 }
 0x316   :  { %3547 = vmatpush3.bf16.msra.mxu1 %v3975_v2 }
 0x317   :  { %3548 = vmatprep.subr.bf16.mxu1 %v4134_v37 }
 0x31a   :  { %3549 = vmatpush3.bf16.msra.mxu1 %v3976_v3  ;;  %v4005_v3 = vld [vmem:[#allocation4 + $0x478] sm:$0xff]  }
 0x31b   :  { %3550 = vmatprep.subr.bf16.mxu1 %v4134_v37 }
 0x31e   :  { %3551 = vmatpush3.bf16.msra.mxu1 %v3977_v4 }
 0x31f   :  { %3552 = vmatprep.subr.bf16.mxu1 %v4134_v37 }
 0x322   :  { %3553 = vmatpush3.bf16.msra.mxu1 %v3978_v5 }
 0x323   :  { %3554 = vmatprep.subr.bf16.mxu1 %v4134_v37 }
 0x326   :  { %3555 = vmatpush3.bf16.msra.mxu1 %v3979_v16  ;;  %v4013_v16 = vld [vmem:[#allocation4 + $0x4b8] sm:$0xff]  }
 0x327   :  { %3556 = vmatprep.subr.bf16.mxu1 %v4134_v37 }
 0x32a   :  { %3557 = vmatpush3.bf16.msra.mxu1 %v3980_v17  ;;  %v4014_v17 = vld [vmem:[#allocation4 + $0x4b0] sm:$0xff]  }
 0x32b   :  { %3582 = vmatprep.subr.bf16.mxu1 %v4134_v37 }
 0x3ad   :  { %v1442_v44 = vpop.f32.mrf.mxu1 }
 0x3ae   :  { %v1443_v45 = vadd.f32 %v1442_v44, %v1358_v43 }
 0x3af   :  { %v3480_v46 = vpop.f32.mrf.mxu1 }
 0x3b0   :  { %v1448_v47 = vmax.f32 %v1443_v45, 0.0 }
 0x3b1   :  { %v1445_v48 = vpop.f32.mrf.mxu1 }
 0x3b2   :  { %v1466_v50 = vpack.c.bf16 %v1448_v47, %v1448_v47 }
 0x3b3   :  { %v3481_v51 = vpop.f32.mrf.mxu1 }
 0x3b4   :  { %3499 = vmatmul.mubr.bf16.vlgmr.msra.gmra.mxu0 %v1466_v50  ;;  %v3990_v51 = vld [vmem:[#allocation4 + $0x430] sm:$0xff]  }
 0x3b5   :  { %3523 = vmatpush3.bf16.msra.mxu0 %v3965_v49  ;;  %3538 = vmatprep.mubr.msk.bf16.mxu0 %vm4135_vm0, %v4134_v37  ;;  %v3989_v49 = vld [vmem:[#allocation4 + $0x438] sm:$0xff]  }
 0x3b6   :  { %3524 = vmatprep.subr.bf16.mxu0 %v4134_v37 }
 0x3b9   :  { %3525 = vmatpush3.bf16.msra.mxu0 %v3966_v52  ;;  %v3991_v52 = vld [vmem:[#allocation4 + $0x428] sm:$0xff]  }
 0x3ba   :  { %3526 = vmatprep.subr.bf16.mxu0 %v4134_v37 }
 0x3bd   :  { %3527 = vmatpush3.bf16.msra.mxu0 %v3967_v53  ;;  %v3992_v53 = vld [vmem:[#allocation4 + $0x420] sm:$0xff]  }
 0x3be   :  { %3528 = vmatprep.subr.bf16.mxu0 %v4134_v37 }
 0x3c1   :  { %3529 = vmatpush3.bf16.msra.mxu0 %v3968_v54  ;;  %v3993_v54 = vld [vmem:[#allocation4 + $0x418] sm:$0xff]  }
 0x3c2   :  { %3530 = vmatprep.subr.bf16.mxu0 %v4134_v37 }
 0x3c5   :  { %3531 = vmatpush3.bf16.msra.mxu0 %v3969_v55  ;;  %v3994_v55 = vld [vmem:[#allocation4 + $0x410] sm:$0xff]  }
 0x3c6   :  { %3532 = vmatprep.subr.bf16.mxu0 %v4134_v37 }
 0x3c9   :  { %3533 = vmatpush3.bf16.msra.mxu0 %v3970_v56  ;;  %v3995_v56 = vld [vmem:[#allocation4 + $0x408] sm:$0xff]  }
 0x3ca   :  { %3534 = vmatprep.subr.bf16.mxu0 %v4134_v37 }
 0x3cd   :  { %v1654_v57 = vpop.f32.mrf.mxu1  ;;  %3535 = vmatpush3.bf16.msra.mxu0 %v3971_v61 }
 0x3ce   :  { %3536 = vmatprep.subr.bf16.mxu0 %v4134_v37  ;;  %v1655_v8 = vadd.f32 %v1654_v57, %v1571_v6  ;;  %v3996_v57 = vld [vmem:[#allocation4 + $0x400] sm:$0xff]   ;;  %v4006_v6 = vld [vmem:[#allocation4 + $0x470] sm:$0xff]  }
 0x3cf   :  { %v3520_v58 = vpop.f32.mrf.mxu1 }
 0x3d0   :  { %v4003_v58 = vld [vmem:[#allocation4 + $0x3c8] sm:$0xff]  }
 0x3d1   :  { %v1657_v59 = vpop.f32.mrf.mxu1  ;;  %3537 = vmatpush3.bf16.msra.mxu0 %v3972_v62 }
 0x3d2   :  { %3562 = vmatprep.subr.bf16.mxu0 %v4134_v37  ;;  %v4004_v59 = vld [vmem:[#allocation4 + $0x3c0] sm:$0xff]  }
 0x3d3   :  { %v3521_v60 = vpop.f32.mrf.mxu1 }
 0x3d4   :  { %v1893_v60 = vld [vmem:[#allocation6 + $0x21] ss:$0 sm:$0xff] }
 0x474   :  { %v1549_v7 = vpop.f32.mrf.mxu0 }
 0x475   :  { %v1550_v9 = vadd.f32 %v1549_v7, %v1465_v63  ;;  %v4007_v63 = vld [vmem:[#allocation4 + $0x468] sm:$0xff]   ;;  %v4008_v7 = vld [vmem:[#allocation4 + $0x460] sm:$0xff]  }
 0x476   :  { %v3500_v10 = vpop.f32.mrf.mxu0 }
 0x477   :  { %v1660_v11 = vadd.f32 %v1655_v8, %v1550_v9  ;;  %v4009_v8 = vld [vmem:[#allocation4 + $0x458] sm:$0xff]   ;;  %v4010_v9 = vld [vmem:[#allocation4 + $0x450] sm:$0xff]  }
 0x478   :  { %v1552_v12 = vpop.f32.mrf.mxu0 }
 0x479   :  { %v4244_v13 = vmax.f32 %v1660_v11, 0.0 }
 0x47a   :  { %v3501_v14 = vpop.f32.mrf.mxu0 }
 0x47b   :  { %v1679_v15 = vpack.c.bf16 %v4244_v13, %v4244_v13  ;;  %v4011_v14 = vld [vmem:[#allocation4 + $0x448] sm:$0xff]  }
 0x47d   :  { %3539 = vmatmul.mubr.bf16.vlgmr.msra.gmra.mxu0 %v1679_v15  ;;  %v4012_v15 = vld [vmem:[#allocation4 + $0x440] sm:$0xff]  }
 0x47e   :  { %3578 = vmatprep.mubr.msk.bf16.mxu0 %vm4135_vm0, %v4134_v37  ;;  %3563 = vmatpush3.bf16.msra.mxu0 %v3981_v18  ;;  %v4015_v18 = vld [vmem:[#allocation4 + $0x4a8] sm:$0xff]  }
 0x47f   :  { %3564 = vmatprep.subr.bf16.mxu0 %v4134_v37 }
 0x482   :  { %3565 = vmatpush3.bf16.msra.mxu0 %v3982_v19  ;;  %v4016_v19 = vld [vmem:[#allocation4 + $0x4a0] sm:$0xff]  }
 0x483   :  { %3566 = vmatprep.subr.bf16.mxu0 %v4134_v37 }
 0x486   :  { %3567 = vmatpush3.bf16.msra.mxu0 %v3983_v20  ;;  %v4017_v20 = vld [vmem:[#allocation4 + $0x498] sm:$0xff]  }
 0x487   :  { %3568 = vmatprep.subr.bf16.mxu0 %v4134_v37 }
 0x48a   :  { %3569 = vmatpush3.bf16.msra.mxu0 %v3984_v21  ;;  %v4018_v21 = vld [vmem:[#allocation4 + $0x490] sm:$0xff]  }
 0x48b   :  { %3570 = vmatprep.subr.bf16.mxu0 %v4134_v37 }
 0x48e   :  { %3571 = vmatpush3.bf16.msra.mxu0 %v3985_v22  ;;  %v2106_v22 = vld [vmem:[#allocation6 + $0x23] ss:$0 sm:$0xff] }
 0x48f   :  { %3572 = vmatprep.subr.bf16.mxu0 %v4134_v37 }
 0x492   :  { %3573 = vmatpush3.bf16.msra.mxu0 %v3986_v23  ;;  %v2000_v23 = vld [vmem:[#allocation6 + $0x22] ss:$0 sm:$0xff] }
 0x493   :  { %3574 = vmatprep.subr.bf16.mxu0 %v4134_v37 }
 0x496   :  { %3575 = vmatpush3.bf16.msra.mxu0 %v3987_v32 }
 0x497   :  { %3576 = vmatprep.subr.bf16.mxu0 %v4134_v37 }
 0x49a   :  { %3577 = vmatpush3.bf16.msra.mxu0 %v3988_v33  ;;  %v4019_v33 = vld [vmem:[#allocation4 + $0x488] sm:$0xff]  }
 0x49b   :  { %3602 = vmatprep.subr.bf16.mxu0 %v4134_v37 }
 0x53d   :  { %v1762_v25 = vpop.f32.mrf.mxu0 }
 0x53e   :  { %v1763_v26 = vadd.f32 %v1762_v25, %v1678_v24 }
 0x53f   :  { %v3540_v27 = vpop.f32.mrf.mxu0 }
 0x540   :  { %v1768_v28 = vmax.f32 %v1763_v26, 0.0 }
 0x541   :  { %v1765_v29 = vpop.f32.mrf.mxu0 }
 0x542   :  { %v1786_v30 = vpack.c.bf16 %v1768_v28, %v1768_v28 }
 0x543   :  { %v3541_v31 = vpop.f32.mrf.mxu0 }
 0x544   :  { %3559 = vmatmul.mubr.bf16.vlgmr.msra.gmra.mxu1 %v1786_v30 }
 0x545   :  { %3598 = vmatprep.mubr.msk.bf16.mxu1 %vm4135_vm0, %v4134_v37  ;;  %3583 = vmatpush3.bf16.msra.mxu1 %v3997_v34  ;;  %v4020_v34 = vld [vmem:[#allocation4 + $0x480] sm:$0xff]  }
 0x546   :  { %3584 = vmatprep.subr.bf16.mxu1 %v4134_v37 }
 0x549   :  { %3585 = vmatpush3.bf16.msra.mxu1 %v3998_v35  ;;  %v4021_v35 = vld [vmem:[#allocation4 + $0x4f8] sm:$0xff]  }
 0x54a   :  { %3586 = vmatprep.subr.bf16.mxu1 %v4134_v37 }
 0x54d   :  { %3587 = vmatpush3.bf16.msra.mxu1 %v3999_v36  ;;  %v4022_v36 = vld [vmem:[#allocation4 + $0x4f0] sm:$0xff]  }
 0x54e   :  { %3588 = vmatprep.subr.bf16.mxu1 %v4134_v37 }
 0x551   :  { %3589 = vmatpush3.bf16.msra.mxu1 %v4000_v38  ;;  %v4023_v38 = vld [vmem:[#allocation4 + $0x4e8] sm:$0xff]  }
 0x552   :  { %3590 = vmatprep.subr.bf16.mxu1 %v4134_v37 }
 0x555   :  { %3591 = vmatpush3.bf16.msra.mxu1 %v4001_v39  ;;  %v4024_v39 = vld [vmem:[#allocation4 + $0x4e0] sm:$0xff]  }
 0x556   :  { %3592 = vmatprep.subr.bf16.mxu1 %v4134_v37 }
 0x559   :  { %3593 = vmatpush3.bf16.msra.mxu1 %v4002_v40  ;;  %v4025_v40 = vld [vmem:[#allocation4 + $0x4d8] sm:$0xff]  }
 0x55a   :  { %3594 = vmatprep.subr.bf16.mxu1 %v4134_v37 }
 0x55d   :  { %3595 = vmatpush3.bf16.msra.mxu1 %v4003_v58  ;;  %v2320_v58 = vld [vmem:[#allocation6 + $0x25] ss:$0 sm:$0xff] }
 0x55e   :  { %3596 = vmatprep.subr.bf16.mxu1 %v4134_v37 }
 0x561   :  { %3597 = vmatpush3.bf16.msra.mxu1 %v4004_v59 }
 0x562   :  { %3622 = vmatprep.subr.bf16.mxu1 %v4134_v37 }
 0x604   :  { %v1869_v42 = vpop.f32.mrf.mxu1 }
 0x605   :  { %v1870_v43 = vadd.f32 %v1869_v42, %v1785_v41  ;;  %v4026_v41 = vld [vmem:[#allocation4 + $0x4d0] sm:$0xff]   ;;  %v2213_v42 = vld [vmem:[#allocation6 + $0x24] ss:$0 sm:$0xff] }
 0x606   :  { %v3560_v44 = vpop.f32.mrf.mxu1 }
 0x607   :  { %v1875_v45 = vadd.f32 %v1870_v43, %v4244_v13 }
 0x608   :  { %v1872_v46 = vpop.f32.mrf.mxu1 }
 0x609   :  { %v1876_v47 = vmax.f32 %v1875_v45, 0.0 }
 0x60a   :  { %v3561_v48 = vpop.f32.mrf.mxu1 }
 0x60b   :  { %v1894_v50 = vpack.c.bf16 %v1876_v47, %v1876_v47 }
 0x60d   :  { %3579 = vmatmul.mubr.bf16.vlgmr.msra.gmra.mxu0 %v1894_v50 }
 0x60e   :  { %3603 = vmatpush3.bf16.msra.mxu0 %v3989_v49  ;;  %3618 = vmatprep.mubr.msk.bf16.mxu0 %vm4135_vm0, %v4134_v37 }
 0x60f   :  { %3604 = vmatprep.subr.bf16.mxu0 %v4134_v37 }
 0x612   :  { %3605 = vmatpush3.bf16.msra.mxu0 %v3990_v51  ;;  %v4028_v51 = vld [vmem:[#allocation4 + $0x4c0] sm:$0xff]  }
 0x613   :  { %3606 = vmatprep.subr.bf16.mxu0 %v4134_v37 }
 0x616   :  { %3607 = vmatpush3.bf16.msra.mxu0 %v3991_v52  ;;  %v4037_v52 = vld [vmem:[#allocation4 + $0x538] sm:$0xff]  }
 0x617   :  { %3608 = vmatprep.subr.bf16.mxu0 %v4134_v37 }
 0x61a   :  { %3609 = vmatpush3.bf16.msra.mxu0 %v3992_v53  ;;  %v4038_v53 = vld [vmem:[#allocation4 + $0x530] sm:$0xff]  }
 0x61b   :  { %3610 = vmatprep.subr.bf16.mxu0 %v4134_v37 }
 0x61e   :  { %3611 = vmatpush3.bf16.msra.mxu0 %v3993_v54  ;;  %v4039_v54 = vld [vmem:[#allocation4 + $0x528] sm:$0xff]  }
 0x61f   :  { %3612 = vmatprep.subr.bf16.mxu0 %v4134_v37 }
 0x622   :  { %3613 = vmatpush3.bf16.msra.mxu0 %v3994_v55  ;;  %v4040_v55 = vld [vmem:[#allocation4 + $0x520] sm:$0xff]  }
 0x623   :  { %3614 = vmatprep.subr.bf16.mxu0 %v4134_v37 }
 0x626   :  { %3615 = vmatpush3.bf16.msra.mxu0 %v3995_v56  ;;  %v4041_v56 = vld [vmem:[#allocation4 + $0x518] sm:$0xff]  }
 0x627   :  { %3616 = vmatprep.subr.bf16.mxu0 %v4134_v37 }
 0x62a   :  { %3617 = vmatpush3.bf16.msra.mxu0 %v3996_v57  ;;  %v4042_v57 = vld [vmem:[#allocation4 + $0x510] sm:$0xff]  }
 0x62b   :  { %3642 = vmatprep.subr.bf16.mxu0 %v4134_v37 }
 0x62d   :  { %3619 = vmatmul.mubr.bf16.vlgmr.msra.gmra.mxu0 %v1894_v50  ;;  %v4027_v50 = vld [vmem:[#allocation4 + $0x4c8] sm:$0xff]  }
 0x62e   :  { %3658 = vmatprep.mubr.msk.bf16.mxu0 %vm4135_vm0, %v4134_v37  ;;  %3643 = vmatpush3.bf16.msra.mxu0 %v4013_v16 }
 0x62f   :  { %3644 = vmatprep.subr.bf16.mxu0 %v4134_v37 }
 0x632   :  { %3645 = vmatpush3.bf16.msra.mxu0 %v4014_v17 }
 0x633   :  { %3646 = vmatprep.subr.bf16.mxu0 %v4134_v37 }
 0x636   :  { %3647 = vmatpush3.bf16.msra.mxu0 %v4015_v18 }
 0x637   :  { %3648 = vmatprep.subr.bf16.mxu0 %v4134_v37 }
 0x63a   :  { %3649 = vmatpush3.bf16.msra.mxu0 %v4016_v19  ;;  %v4045_v19 = vld [vmem:[#allocation4 + $0x5b8] sm:$0xff]  }
 0x63b   :  { %3650 = vmatprep.subr.bf16.mxu0 %v4134_v37 }
 0x63e   :  { %3651 = vmatpush3.bf16.msra.mxu0 %v4017_v20 }
 0x63f   :  { %3652 = vmatprep.subr.bf16.mxu0 %v4134_v37 }
 0x642   :  { %3653 = vmatpush3.bf16.msra.mxu0 %v4018_v21 }
 0x643   :  { %3654 = vmatprep.subr.bf16.mxu0 %v4134_v37 }
 0x646   :  { %3655 = vmatpush3.bf16.msra.mxu0 %v4019_v33  ;;  %v4053_v33 = vld [vmem:[#allocation4 + $0x5f8] sm:$0xff]  }
 0x647   :  { %3656 = vmatprep.subr.bf16.mxu0 %v4134_v37 }
 0x64a   :  { %3657 = vmatpush3.bf16.msra.mxu0 %v4020_v34  ;;  %v4054_v34 = vld [vmem:[#allocation4 + $0x5f0] sm:$0xff]  }
 0x64b   :  { %3682 = vmatprep.subr.bf16.mxu0 %v4134_v37 }
 0x6cd   :  { %v1977_v61 = vpop.f32.mrf.mxu0 }
 0x6ce   :  { %v1978_v62 = vadd.f32 %v1977_v61, %v1893_v60 }
 0x6cf   :  { %v3580_v0 = vpop.f32.mrf.mxu0 }
 0x6d0   :  { %v1983_v1 = vmax.f32 %v1978_v62, 0.0 }
 0x6d1   :  { %v1980_v2 = vpop.f32.mrf.mxu0 }
 0x6d2   :  { %v2001_v4 = vpack.c.bf16 %v1983_v1, %v1983_v1 }
 0x6d3   :  { %v3581_v5 = vpop.f32.mrf.mxu0 }
 0x6d4   :  { %3599 = vmatmul.mubr.bf16.vlgmr.msra.gmra.mxu1 %v2001_v4  ;;  %v4030_v5 = vld [vmem:[#allocation4 + $0x570] sm:$0xff]  }
 0x6d5   :  { %3623 = vmatpush3.bf16.msra.mxu1 %v4005_v3  ;;  %3638 = vmatprep.mubr.msk.bf16.mxu1 %vm4135_vm0, %v4134_v37  ;;  %v4029_v3 = vld [vmem:[#allocation4 + $0x578] sm:$0xff]  }
 0x6d6   :  { %3624 = vmatprep.subr.bf16.mxu1 %v4134_v37 }
 0x6d9   :  { %3625 = vmatpush3.bf16.msra.mxu1 %v4006_v6  ;;  %v4031_v6 = vld [vmem:[#allocation4 + $0x568] sm:$0xff]  }
 0x6da   :  { %3626 = vmatprep.subr.bf16.mxu1 %v4134_v37 }
 0x6dd   :  { %3627 = vmatpush3.bf16.msra.mxu1 %v4007_v63  ;;  %v4032_v63 = vld [vmem:[#allocation4 + $0x560] sm:$0xff]  }
 0x6de   :  { %3628 = vmatprep.subr.bf16.mxu1 %v4134_v37 }
 0x6e1   :  { %3629 = vmatpush3.bf16.msra.mxu1 %v4008_v7  ;;  %v4033_v7 = vld [vmem:[#allocation4 + $0x558] sm:$0xff]  }
 0x6e2   :  { %3630 = vmatprep.subr.bf16.mxu1 %v4134_v37 }
 0x6e5   :  { %3631 = vmatpush3.bf16.msra.mxu1 %v4009_v8  ;;  %v4034_v8 = vld [vmem:[#allocation4 + $0x550] sm:$0xff]  }
 0x6e6   :  { %3632 = vmatprep.subr.bf16.mxu1 %v4134_v37 }
 0x6e9   :  { %3633 = vmatpush3.bf16.msra.mxu1 %v4010_v9  ;;  %v4035_v9 = vld [vmem:[#allocation4 + $0x548] sm:$0xff]  }
 0x6ea   :  { %3634 = vmatprep.subr.bf16.mxu1 %v4134_v37 }
 0x6ed   :  { %v2189_v10 = vpop.f32.mrf.mxu0  ;;  %3635 = vmatpush3.bf16.msra.mxu1 %v4011_v14 }
 0x6ee   :  { %3636 = vmatprep.subr.bf16.mxu1 %v4134_v37  ;;  %v2190_v25 = vadd.f32 %v2189_v10, %v2106_v22  ;;  %v4036_v10 = vld [vmem:[#allocation4 + $0x540] sm:$0xff]   ;;  %v4046_v22 = vld [vmem:[#allocation4 + $0x5b0] sm:$0xff]  }
 0x6ef   :  { %v3620_v11 = vpop.f32.mrf.mxu0 }
 0x6f0   :  { %v4043_v11 = vld [vmem:[#allocation4 + $0x508] sm:$0xff]  }
 0x6f1   :  { %v2192_v12 = vpop.f32.mrf.mxu0  ;;  %3637 = vmatpush3.bf16.msra.mxu1 %v4012_v15 }
 0x6f2   :  { %3662 = vmatprep.subr.bf16.mxu1 %v4134_v37  ;;  %v4044_v12 = vld [vmem:[#allocation4 + $0x500] sm:$0xff]  }
 0x6f3   :  { %v3621_v13 = vpop.f32.mrf.mxu0 }
 0x6f4   :  { %v2428_v13 = vld [vmem:[#allocation6 + $0x26] ss:$0 sm:$0xff] }
 0x794   :  { %v2084_v24 = vpop.f32.mrf.mxu1 }
 0x795   :  { %v2085_v26 = vadd.f32 %v2084_v24, %v2000_v23  ;;  %v4047_v23 = vld [vmem:[#allocation4 + $0x5a8] sm:$0xff]   ;;  %v4048_v24 = vld [vmem:[#allocation4 + $0x5a0] sm:$0xff]  }
 0x796   :  { %v3600_v27 = vpop.f32.mrf.mxu1 }
 0x797   :  { %v2195_v28 = vadd.f32 %v2190_v25, %v2085_v26  ;;  %v4049_v25 = vld [vmem:[#allocation4 + $0x598] sm:$0xff]   ;;  %v4050_v26 = vld [vmem:[#allocation4 + $0x590] sm:$0xff]  }
 0x798   :  { %v2087_v29 = vpop.f32.mrf.mxu1 }
 0x799   :  { %v4299_v30 = vmax.f32 %v2195_v28, 0.0 }
 0x79a   :  { %v3601_v31 = vpop.f32.mrf.mxu1 }
 0x79b   :  { %v2214_v32 = vpack.c.bf16 %v4299_v30, %v4299_v30  ;;  %v4051_v31 = vld [vmem:[#allocation4 + $0x588] sm:$0xff]  }
 0x79d   :  { %3639 = vmatmul.mubr.bf16.vlgmr.msra.gmra.mxu1 %v2214_v32  ;;  %v4052_v32 = vld [vmem:[#allocation4 + $0x580] sm:$0xff]  }
 0x79e   :  { %3678 = vmatprep.mubr.msk.bf16.mxu1 %vm4135_vm0, %v4134_v37  ;;  %3663 = vmatpush3.bf16.msra.mxu1 %v4021_v35  ;;  %v4055_v35 = vld [vmem:[#allocation4 + $0x5e8] sm:$0xff]  }
 0x79f   :  { %3664 = vmatprep.subr.bf16.mxu1 %v4134_v37 }
 0x7a2   :  { %3665 = vmatpush3.bf16.msra.mxu1 %v4022_v36  ;;  %v4056_v36 = vld [vmem:[#allocation4 + $0x5e0] sm:$0xff]  }
 0x7a3   :  { %3666 = vmatprep.subr.bf16.mxu1 %v4134_v37 }
 0x7a6   :  { %3667 = vmatpush3.bf16.msra.mxu1 %v4023_v38  ;;  %v4057_v38 = vld [vmem:[#allocation4 + $0x5d8] sm:$0xff]  }
 0x7a7   :  { %3668 = vmatprep.subr.bf16.mxu1 %v4134_v37 }
 0x7aa   :  { %3669 = vmatpush3.bf16.msra.mxu1 %v4024_v39  ;;  %v4058_v39 = vld [vmem:[#allocation4 + $0x5d0] sm:$0xff]  }
 0x7ab   :  { %3670 = vmatprep.subr.bf16.mxu1 %v4134_v37 }
 0x7ae   :  { %3671 = vmatpush3.bf16.msra.mxu1 %v4025_v40  ;;  %v2641_v40 = vld [vmem:[#allocation6 + $0x40] ss:$0 sm:$0xff] }
 0x7af   :  { %3672 = vmatprep.subr.bf16.mxu1 %v4134_v37 }
 0x7b2   :  { %3673 = vmatpush3.bf16.msra.mxu1 %v4026_v41  ;;  %v2535_v41 = vld [vmem:[#allocation6 + $0x27] ss:$0 sm:$0xff] }
 0x7b3   :  { %3674 = vmatprep.subr.bf16.mxu1 %v4134_v37 }
 0x7b6   :  { %3675 = vmatpush3.bf16.msra.mxu1 %v4027_v50 }
 0x7b7   :  { %3676 = vmatprep.subr.bf16.mxu1 %v4134_v37 }
 0x7ba   :  { %3677 = vmatpush3.bf16.msra.mxu1 %v4028_v51  ;;  %v4059_v51 = vld [vmem:[#allocation4 + $0x5c8] sm:$0xff]  }
 0x7bb   :  { %3702 = vmatprep.subr.bf16.mxu1 %v4134_v37 }
 0x85d   :  { %v2297_v43 = vpop.f32.mrf.mxu1 }
 0x85e   :  { %v2298_v44 = vadd.f32 %v2297_v43, %v2213_v42 }
 0x85f   :  { %v3640_v45 = vpop.f32.mrf.mxu1 }
 0x860   :  { %v2303_v46 = vmax.f32 %v2298_v44, 0.0 }
 0x861   :  { %v2300_v47 = vpop.f32.mrf.mxu1 }
 0x862   :  { %v2321_v48 = vpack.c.bf16 %v2303_v46, %v2303_v46 }
 0x863   :  { %v3641_v49 = vpop.f32.mrf.mxu1 }
 0x864   :  { %3659 = vmatmul.mubr.bf16.vlgmr.msra.gmra.mxu0 %v2321_v48 }
 0x865   :  { %3698 = vmatprep.mubr.msk.bf16.mxu0 %vm4135_vm0, %v4134_v37  ;;  %3683 = vmatpush3.bf16.msra.mxu0 %v4037_v52  ;;  %v4060_v52 = vld [vmem:[#allocation4 + $0x5c0] sm:$0xff]  }
 0x866   :  { %3684 = vmatprep.subr.bf16.mxu0 %v4134_v37 }
 0x869   :  { %3685 = vmatpush3.bf16.msra.mxu0 %v4038_v53  ;;  %v2748_v53 = vld [vmem:[#allocation6 + $0x41] ss:$0 sm:$0xff] }
 0x86a   :  { %3686 = vmatprep.subr.bf16.mxu0 %v4134_v37 }
 0x86d   :  { %3687 = vmatpush3.bf16.msra.mxu0 %v4039_v54 }
 0x86e   :  { %3688 = vmatprep.subr.bf16.mxu0 %v4134_v37 }
 0x871   :  { %3689 = vmatpush3.bf16.msra.mxu0 %v4040_v55 }
 0x872   :  { %3690 = vmatprep.subr.bf16.mxu0 %v4134_v37 }
 0x875   :  { %3691 = vmatpush3.bf16.msra.mxu0 %v4041_v56 }
 0x876   :  { %3692 = vmatprep.subr.bf16.mxu0 %v4134_v37 }
 0x879   :  { %3693 = vmatpush3.bf16.msra.mxu0 %v4042_v57 }
 0x87a   :  { %3694 = vmatprep.subr.bf16.mxu0 %v4134_v37 }
 0x87d   :  { %3695 = vmatpush3.bf16.msra.mxu0 %v4043_v11 }
 0x87e   :  { %3696 = vmatprep.subr.bf16.mxu0 %v4134_v37 }
 0x881   :  { %3697 = vmatpush3.bf16.msra.mxu0 %v4044_v12 }
 0x882   :  { %3722 = vmatprep.subr.bf16.mxu0 %v4134_v37 }
 0x924   :  { %v2404_v59 = vpop.f32.mrf.mxu0 }
 0x925   :  { %v2405_v60 = vadd.f32 %v2404_v59, %v2320_v58 }
 0x926   :  { %v3660_v61 = vpop.f32.mrf.mxu0 }
 0x927   :  { %v2410_v62 = vadd.f32 %v2405_v60, %v4299_v30  ;;  %v2855_v61 = vld [vmem:[#allocation6 + $0x42] ss:$0 sm:$0xff] }
 0x928   :  { %v2407_v0 = vpop.f32.mrf.mxu0 }
 0x929   :  { %v2411_v1 = vmax.f32 %v2410_v62, 0.0 }
 0x92a   :  { %v3661_v2 = vpop.f32.mrf.mxu0 }
 0x92b   :  { %v2429_v4 = vpack.c.bf16 %v2411_v1, %v2411_v1 }
 0x92d   :  { %3679 = vmatmul.mubr.bf16.vlgmr.msra.gmra.mxu1 %v2429_v4 }
 0x92e   :  { %3703 = vmatpush3.bf16.msra.mxu1 %v4029_v3  ;;  %3718 = vmatprep.mubr.msk.bf16.mxu1 %vm4135_vm0, %v4134_v37 }
 0x92f   :  { %3704 = vmatprep.subr.bf16.mxu1 %v4134_v37 }
 0x932   :  { %3705 = vmatpush3.bf16.msra.mxu1 %v4030_v5 }
 0x933   :  { %3706 = vmatprep.subr.bf16.mxu1 %v4134_v37 }
 0x936   :  { %3707 = vmatpush3.bf16.msra.mxu1 %v4031_v6 }
 0x937   :  { %3708 = vmatprep.subr.bf16.mxu1 %v4134_v37 }
 0x93a   :  { %3709 = vmatpush3.bf16.msra.mxu1 %v4032_v63 }
 0x93b   :  { %3710 = vmatprep.subr.bf16.mxu1 %v4134_v37 }
 0x93e   :  { %3711 = vmatpush3.bf16.msra.mxu1 %v4033_v7 }
 0x93f   :  { %3712 = vmatprep.subr.bf16.mxu1 %v4134_v37 }
 0x942   :  { %3713 = vmatpush3.bf16.msra.mxu1 %v4034_v8 }
 0x943   :  { %3714 = vmatprep.subr.bf16.mxu1 %v4134_v37 }
 0x946   :  { %3715 = vmatpush3.bf16.msra.mxu1 %v4035_v9 }
 0x947   :  { %3716 = vmatprep.subr.bf16.mxu1 %v4134_v37 }
 0x94a   :  { %3717 = vmatpush3.bf16.msra.mxu1 %v4036_v10 }
 0x94b   :  { %3742 = vmatprep.subr.bf16.mxu1 %v4134_v37 }
 0x94d   :  { %3719 = vmatmul.mubr.bf16.vlgmr.msra.gmra.mxu1 %v2429_v4 }
 0x94e   :  { %3758 = vmatprep.mubr.msk.bf16.mxu1 %vm4135_vm0, %v4134_v37  ;;  %3743 = vmatpush3.bf16.msra.mxu1 %v4053_v33 }
 0x94f   :  { %3744 = vmatprep.subr.bf16.mxu1 %v4134_v37 }
 0x952   :  { %3745 = vmatpush3.bf16.msra.mxu1 %v4054_v34 }
 0x953   :  { %3746 = vmatprep.subr.bf16.mxu1 %v4134_v37 }
 0x956   :  { %3747 = vmatpush3.bf16.msra.mxu1 %v4055_v35 }
 0x957   :  { %3748 = vmatprep.subr.bf16.mxu1 %v4134_v37 }
 0x95a   :  { %3749 = vmatpush3.bf16.msra.mxu1 %v4056_v36 }
 0x95b   :  { %3750 = vmatprep.subr.bf16.mxu1 %v4134_v37 }
 0x95e   :  { %3751 = vmatpush3.bf16.msra.mxu1 %v4057_v38 }
 0x95f   :  { %3752 = vmatprep.subr.bf16.mxu1 %v4134_v37 }
 0x962   :  { %3753 = vmatpush3.bf16.msra.mxu1 %v4058_v39 }
 0x963   :  { %3754 = vmatprep.subr.bf16.mxu1 %v4134_v37 }
 0x966   :  { %3755 = vmatpush3.bf16.msra.mxu1 %v4059_v51 }
 0x967   :  { %3756 = vmatprep.subr.bf16.mxu1 %v4134_v37 }
 0x96a   :  { %3757 = vmatpush3.bf16.msra.mxu1 %v4060_v52 }
 0x9ed   :  { %v2512_v14 = vpop.f32.mrf.mxu1 }
 0x9ee   :  { %v2513_v15 = vadd.f32 %v2512_v14, %v2428_v13 }
 0x9ef   :  { %v3680_v16 = vpop.f32.mrf.mxu1 }
 0x9f0   :  { %v2518_v17 = vmax.f32 %v2513_v15, 0.0 }
 0x9f1   :  { %v2515_v18 = vpop.f32.mrf.mxu1 }
 0x9f2   :  { %v2536_v20 = vpack.c.bf16 %v2518_v17, %v2518_v17 }
 0x9f3   :  { %v3681_v21 = vpop.f32.mrf.mxu1 }
 0x9f4   :  { %3699 = vmatmul.mubr.bf16.vlgmr.msra.gmra.mxu0 %v2536_v20 }
 0x9f5   :  { %3723 = vmatpush3.bf16.msra.mxu0 %v4045_v19  ;;  %3738 = vmatprep.mubr.msk.bf16.mxu0 %vm4135_vm0, %v4134_v37 }
 0x9f6   :  { %3724 = vmatprep.subr.bf16.mxu0 %v4134_v37 }
 0x9f9   :  { %3725 = vmatpush3.bf16.msra.mxu0 %v4046_v22 }
 0x9fa   :  { %3726 = vmatprep.subr.bf16.mxu0 %v4134_v37 }
 0x9fd   :  { %3727 = vmatpush3.bf16.msra.mxu0 %v4047_v23 }
 0x9fe   :  { %3728 = vmatprep.subr.bf16.mxu0 %v4134_v37 }
 0xa01   :  { %3729 = vmatpush3.bf16.msra.mxu0 %v4048_v24 }
 0xa02   :  { %3730 = vmatprep.subr.bf16.mxu0 %v4134_v37 }
 0xa05   :  { %3731 = vmatpush3.bf16.msra.mxu0 %v4049_v25 }
 0xa06   :  { %3732 = vmatprep.subr.bf16.mxu0 %v4134_v37 }
 0xa09   :  { %3733 = vmatpush3.bf16.msra.mxu0 %v4050_v26 }
 0xa0a   :  { %3734 = vmatprep.subr.bf16.mxu0 %v4134_v37 }
 0xa0d   :  { %v2724_v27 = vpop.f32.mrf.mxu1  ;;  %3735 = vmatpush3.bf16.msra.mxu0 %v4051_v31 }
 0xa0e   :  { %3736 = vmatprep.subr.bf16.mxu0 %v4134_v37  ;;  %v2725_v43 = vadd.f32 %v2724_v27, %v2641_v40 }
 0xa0f   :  { %v3720_v28 = vpop.f32.mrf.mxu1 }
 0xa11   :  { %v2727_v29 = vpop.f32.mrf.mxu1  ;;  %3737 = vmatpush3.bf16.msra.mxu0 %v4052_v32 }
 0xa13   :  { %v3721_v30 = vpop.f32.mrf.mxu1 }
 0xab4   :  { %v2619_v42 = vpop.f32.mrf.mxu0 }
 0xab5   :  { %v2620_v44 = vadd.f32 %v2619_v42, %v2535_v41 }
 0xab6   :  { %v3700_v45 = vpop.f32.mrf.mxu0 }
 0xab7   :  { %v2730_v46 = vadd.f32 %v2725_v43, %v2620_v44 }
 0xab8   :  { %v2622_v47 = vpop.f32.mrf.mxu0 }
 0xab9   :  { %v2731_v48 = vmax.f32 %v2730_v46, 0.0 }
 0xaba   :  { %v3701_v49 = vpop.f32.mrf.mxu0 }
 0xabb   :  { %v2749_v50 = vpack.c.bf16 %v2731_v48, %v2731_v48 }
 0xabd   :  { %3739 = vmatmul.mubr.bf16.vlgmr.msra.gmra.mxu0 %v2749_v50 }
 0xb7d   :  { %v2832_v54 = vpop.f32.mrf.mxu0 }
 0xb7e   :  { %v2833_v55 = vadd.f32 %v2832_v54, %v2748_v53 }
 0xb7f   :  { %v3740_v56 = vpop.f32.mrf.mxu0 }
 0xb80   :  { %v2838_v57 = vmax.f32 %v2833_v55, 0.0 }
 0xb81   :  { %v2835_v58 = vpop.f32.mrf.mxu0 }
 0xb82   :  { %v2856_v59 = vpack.c.bf16 %v2838_v57, %v2838_v57 }
 0xb83   :  { %v3741_v60 = vpop.f32.mrf.mxu0 }
 0xb84   :  { %3759 = vmatmul.mubr.bf16.vlgmr.msra.gmra.mxu1 %v2856_v59 }
 0xc44   :  { %v2939_v62 = vpop.f32.mrf.mxu1 }
 0xc45   :  { %v2940_v0 = vadd.f32 %v2939_v62, %v2855_v61 }
 0xc46   :  { %v3760_v1 = vpop.f32.mrf.mxu1 }
 0xc47   :  { %v2945_v2 = vadd.f32 %v2940_v0, %v2731_v48 }
 0xc48   :  { %v2942_v3 = vpop.f32.mrf.mxu1 }
 0xc49   :  { %v2946_v4 = vmax.f32 %v2945_v2, 0.0 }
 0xc4a   :  { %v3761_v5 = vpop.f32.mrf.mxu1 }
 0xc4b   :  { %2947 = vst [vmem:[%s4361_s4] sm:$0xff] %v2946_v4 }
 0xc4c   :  { %2952 = vsyncpa [#allocation3], 1 }
 0xc4d   :  { %2953 = vsyncpa [#allocation5], 1 }

</bundles_post_ra>
